<compile_context>
chip_gen: v7x
topology: tpu7x:2x2x1
jax: 0.10.0
libtpu: 0.0.40
codegen_flags: <defaults>
</compile_context>

<pallas_src>
import math
import functools

import jax
import jax.numpy as jnp
from jax.experimental import pallas as pl
from jax.experimental.pallas import tpu as pltpu


def _layernorm(v, g, b, eps=1e-5):
    # torch.nn.LayerNorm semantics: biased variance over last dim, eps=1e-5
    mu = jnp.mean(v, axis=-1, keepdims=True)
    var = jnp.mean(jnp.square(v - mu), axis=-1, keepdims=True)
    return (v - mu) * jax.lax.rsqrt(var + eps) * g + b


def _attn_kernel(x_ref, lat_ref, gm_ref, bm_ref, gl_ref, bl_ref,
                 wq_ref, wk_ref, wv_ref, wo_ref, out_ref, *, heads, dim_head):
    bt, n_x, d = x_ref.shape
    _, n_l, _ = lat_ref.shape
    inner = heads * dim_head
    n_kv = n_x + n_l

    # ---- LayerNorm (f32) over flattened (bt*N, D) rows ---------------------
    x2 = x_ref[...].astype(jnp.float32).reshape(bt * n_x, d)
    l2 = lat_ref[...].astype(jnp.float32).reshape(bt * n_l, d)
    xn = _layernorm(x2, gm_ref[...], bm_ref[...])       # norm_media
    latn = _layernorm(l2, gl_ref[...], bl_ref[...])     # norm_latents

    xn_b = xn.astype(jnp.bfloat16)
    latn_b = latn.astype(jnp.bfloat16)

    wq = wq_ref[...]   # (D, inner)  bf16
    wk = wk_ref[...]   # (D, inner)  bf16
    wv = wv_ref[...]   # (D, inner)  bf16
    wo = wo_ref[...]   # (inner, D)  bf16

    # ---- Projections: bf16 operands, f32 accumulation, scale folded into Q --
    scale = 1.0 / math.sqrt(dim_head)
    q = jnp.dot(latn_b, wq, preferred_element_type=jnp.float32) * scale  # (bt*Nl, inner)
    k_x = jnp.dot(xn_b, wk, preferred_element_type=jnp.float32)          # (bt*Nx, inner)
    v_x = jnp.dot(xn_b, wv, preferred_element_type=jnp.float32)
    k_l = jnp.dot(latn_b, wk, preferred_element_type=jnp.float32)        # (bt*Nl, inner)
    v_l = jnp.dot(latn_b, wv, preferred_element_type=jnp.float32)

    # ---- Attention: heads as a dot_general batch dim, per batch row-tile ----
    # TODO(synk): for very large Nx (production vision-token counts) tile the
    # KV axis flash-attention style (online softmax) instead of one-shot K/V.
    o_rows = []
    for b in range(bt):  # static unroll; bt is small
        qh = q[b * n_l:(b + 1) * n_l, :].astype(jnp.bfloat16)
        qh = qh.reshape(n_l, heads, dim_head)
        kb = jnp.concatenate([k_x[b * n_x:(b + 1) * n_x, :],
                              k_l[b * n_l:(b + 1) * n_l, :]], axis=0)    # (Nkv, inner)
        vb = jnp.concatenate([v_x[b * n_x:(b + 1) * n_x, :],
                              v_l[b * n_l:(b + 1) * n_l, :]], axis=0)
        kh = kb.astype(jnp.bfloat16).reshape(n_kv, heads, dim_head)
        vh = vb.astype(jnp.bfloat16).reshape(n_kv, heads, dim_head)

        s = jnp.einsum("qhd,khd->hqk", qh, kh,
                       preferred_element_type=jnp.float32)               # (H, Nl, Nkv)
        s = s - jnp.max(s, axis=-1, keepdims=True)
        p = jnp.exp(s)
        p = p * pl.reciprocal(jnp.sum(p, axis=-1, keepdims=True), approx=True)
        o = jnp.einsum("hqk,khd->qhd", p.astype(jnp.bfloat16), vh,
                       preferred_element_type=jnp.float32)               # (Nl, H, dh)
        o_rows.append(o.reshape(n_l, inner))

    o_all = jnp.concatenate(o_rows, axis=0).astype(jnp.bfloat16)         # (bt*Nl, inner)

    # ---- Single fused output projection -------------------------------------
    out = jnp.dot(o_all, wo, preferred_element_type=jnp.float32)         # (bt*Nl, D)
    out_ref[...] = out.reshape(bt, n_l, d).astype(out_ref.dtype)


def _pick_batch_tile(B, max_bt=8):
    for c in range(min(B, max_bt), 0, -1):
        if B % c == 0:
            return c
    return 1


def perceiver_sdpa_attention(x, latents, params, *, heads, dim_head, batch_tile=None):
    B, Nx, D = x.shape
    _, Nl, _ = latents.shape
    inner = heads * dim_head

    bt = batch_tile if batch_tile is not None else _pick_batch_tile(B)
    assert B % bt == 0, "batch tile must divide batch"

    # bf16 weights at the call boundary: halves weight DMA bytes and VMEM.
    wq = params["wq"].astype(jnp.bfloat16)
    wk = params["wk"].astype(jnp.bfloat16)
    wv = params["wv"].astype(jnp.bfloat16)
    wo = params["wo"].astype(jnp.bfloat16)
    gm = params["gamma_m"].astype(jnp.float32).reshape(1, D)
    bm = params["beta_m"].astype(jnp.float32).reshape(1, D)
    gl = params["gamma_l"].astype(jnp.float32).reshape(1, D)
    bl = params["beta_l"].astype(jnp.float32).reshape(1, D)

    kernel = functools.partial(_attn_kernel, heads=heads, dim_head=dim_head)

    def const_spec(shape):
        return pl.BlockSpec(shape, lambda b: (0,) * len(shape))

    # Note: weight index_maps are constant across the grid; at production sizes
    # consider pipeline_mode=pl.Buffered(1) on them to drop the redundant
    # second VMEM buffer (matters most on v7x's 64 MiB VMEM).
    return pl.pallas_call(
        kernel,
        out_shape=jax.ShapeDtypeStruct((B, Nl, D), x.dtype),
        grid=(B // bt,),
        in_specs=[
            pl.BlockSpec((bt, Nx, D), lambda b: (b, 0, 0)),   # x
            pl.BlockSpec((bt, Nl, D), lambda b: (b, 0, 0)),   # latents
            const_spec((1, D)),                               # gamma_media
            const_spec((1, D)),                               # beta_media
            const_spec((1, D)),                               # gamma_latents
            const_spec((1, D)),                               # beta_latents
            const_spec((D, inner)),                           # W_q
            const_spec((D, inner)),                           # W_k
            const_spec((D, inner)),                           # W_v
            const_spec((inner, D)),                           # W_out
        ],
        out_specs=pl.BlockSpec((bt, Nl, D), lambda b: (b, 0, 0)),
        compiler_params=pltpu.CompilerParams(
            dimension_semantics=("parallel",),
            vmem_limit_bytes=64 * 1024 * 1024,
        ),
    )(x, latents, gm, bm, gl, bl, wq, wk, wv, wo)


def _reference(x, latents, params, *, heads, dim_head):
    # Pure-JAX f32 reference mirroring the PyTorch forward.
    def ln(v, g, b):
        mu = jnp.mean(v, axis=-1, keepdims=True)
        var = jnp.mean(jnp.square(v - mu), axis=-1, keepdims=True)
        return (v - mu) * jax.lax.rsqrt(var + 1e-5) * g + b

    xn = ln(x, params["gamma_m"], params["beta_m"])
    latn = ln(latents, params["gamma_l"], params["beta_l"])
    q = latn @ params["wq"]
    kv_in = jnp.concatenate([xn, latn], axis=1)
    k = kv_in @ params["wk"]
    v = kv_in @ params["wv"]

    def split_heads(t):
        b, n, _ = t.shape
        return t.reshape(b, n, heads, dim_head).transpose(0, 2, 1, 3)

    qh, kh, vh = split_heads(q), split_heads(k), split_heads(v)
    s = jnp.einsum("bhnd,bhmd->bhnm", qh, kh) / math.sqrt(dim_head)
    p = jax.nn.softmax(s, axis=-1)
    o = jnp.einsum("bhnm,bhmd->bhnd", p, vh)
    o = o.transpose(0, 2, 1, 3).reshape(x.shape[0], latn.shape[1], heads * dim_head)
    return o @ params["wo"]


if __name__ == "__main__":
    key = jax.random.PRNGKey(0)
    B, Nx, Nl, D = 2, 16, 8, 32
    heads, dim_head = 4, 8
    inner = heads * dim_head

    k_x, k_l, k_q, k_kv, k_o = jax.random.split(key, 5)
    x = jax.random.normal(k_x, (B, Nx, D), jnp.float32)
    latents = jax.random.normal(k_l, (B, Nl, D), jnp.float32)

    # Deterministic synthetic parameters (shapes follow the module __init__).
    wkv = jax.random.normal(k_kv, (D, 2 * inner), jnp.float32) * 0.1  # to_kv, chunk(2, -1)
    params = {
        "gamma_m": jnp.ones((1, D), jnp.float32),
        "beta_m": jnp.zeros((1, D), jnp.float32),
        "gamma_l": jnp.ones((1, D), jnp.float32),
        "beta_l": jnp.zeros((1, D), jnp.float32),
        "wq": jax.random.normal(k_q, (D, inner), jnp.float32) * 0.1,
        "wk": wkv[:, :inner],
        "wv": wkv[:, inner:],
        "wo": jax.random.normal(k_o, (inner, D), jnp.float32) * 0.1,
    }

    out = perceiver_sdpa_attention(x, latents, params, heads=heads, dim_head=dim_head)
    out = jax.block_until_ready(out)

    ref = _reference(x, latents, params, heads=heads, dim_head=dim_head)
    assert out.shape == (B, Nl, D)
    # Kernel uses bf16 matmul operands with f32 accumulation -> loose tolerance
    # vs the pure-f32 reference.
    assert jnp.allclose(out, ref, atol=3e-2, rtol=3e-2), "mismatch vs reference"

    print("KERNEL_OK")
</pallas_src>

<mosaic_0001>
module attributes {stable_mosaic.version = 11 : i64} {
  func.func @_attn_kernel(%arg0: i32, %arg1: memref<2x16x32xf32, #tpu.memory_space<vmem>>, %arg2: memref<2x8x32xf32, #tpu.memory_space<vmem>>, %arg3: memref<1x32xf32, #tpu.memory_space<vmem>>, %arg4: memref<1x32xf32, #tpu.memory_space<vmem>>, %arg5: memref<1x32xf32, #tpu.memory_space<vmem>>, %arg6: memref<1x32xf32, #tpu.memory_space<vmem>>, %arg7: memref<32x32xbf16, #tpu.memory_space<vmem>>, %arg8: memref<32x32xbf16, #tpu.memory_space<vmem>>, %arg9: memref<32x32xbf16, #tpu.memory_space<vmem>>, %arg10: memref<32x32xbf16, #tpu.memory_space<vmem>>, %arg11: memref<2x8x32xf32, #tpu.memory_space<vmem>>) attributes {dimension_semantics = [#tpu.dimension_semantics<parallel>], iteration_bounds = array<i64: 1>, scalar_prefetch = 0 : i64, scratch_operands = 0 : i64, tpu.core_type = #tpu.core_type<tc>, window_params = [{transform_indices = @transform_0, window_bounds = array<i64: 2, 16, 32>}, {transform_indices = @transform_1, window_bounds = array<i64: 2, 8, 32>}, {pipeline_mode = #tpu.pipeline_mode<synchronous>, transform_indices = @transform_2, window_bounds = array<i64: 1, 32>}, {pipeline_mode = #tpu.pipeline_mode<synchronous>, transform_indices = @transform_3, window_bounds = array<i64: 1, 32>}, {pipeline_mode = #tpu.pipeline_mode<synchronous>, transform_indices = @transform_4, window_bounds = array<i64: 1, 32>}, {pipeline_mode = #tpu.pipeline_mode<synchronous>, transform_indices = @transform_5, window_bounds = array<i64: 1, 32>}, {pipeline_mode = #tpu.pipeline_mode<synchronous>, transform_indices = @transform_6, window_bounds = array<i64: 32, 32>}, {pipeline_mode = #tpu.pipeline_mode<synchronous>, transform_indices = @transform_7, window_bounds = array<i64: 32, 32>}, {pipeline_mode = #tpu.pipeline_mode<synchronous>, transform_indices = @transform_8, window_bounds = array<i64: 32, 32>}, {pipeline_mode = #tpu.pipeline_mode<synchronous>, transform_indices = @transform_9, window_bounds = array<i64: 32, 32>}, {transform_indices = @transform_10, window_bounds = array<i64: 2, 8, 32>}]} {
    %c0 = arith.constant 0 : index
    %c0_0 = arith.constant 0 : index
    %c0_1 = arith.constant 0 : index
    %0 = vector.load %arg1[%c0, %c0_0, %c0_1] : memref<2x16x32xf32, #tpu.memory_space<vmem>>, vector<2x16x32xf32>
    %1 = vector.shape_cast %0 : vector<2x16x32xf32> to vector<32x32xf32>
    %c0_2 = arith.constant 0 : index
    %c0_3 = arith.constant 0 : index
    %c0_4 = arith.constant 0 : index
    %2 = vector.load %arg2[%c0_2, %c0_3, %c0_4] : memref<2x8x32xf32, #tpu.memory_space<vmem>>, vector<2x8x32xf32>
    %3 = vector.shape_cast %2 : vector<2x8x32xf32> to vector<16x32xf32>
    %c0_5 = arith.constant 0 : index
    %c0_6 = arith.constant 0 : index
    %4 = vector.load %arg3[%c0_5, %c0_6] : memref<1x32xf32, #tpu.memory_space<vmem>>, vector<1x32xf32>
    %c0_7 = arith.constant 0 : index
    %c0_8 = arith.constant 0 : index
    %5 = vector.load %arg4[%c0_7, %c0_8] : memref<1x32xf32, #tpu.memory_space<vmem>>, vector<1x32xf32>
    %cst = arith.constant dense<0.000000e+00> : vector<32xf32>
    %6 = vector.multi_reduction <add>, %1, %cst [1] : vector<32x32xf32> to vector<32xf32>
    %7 = vector.shape_cast %6 : vector<32xf32> to vector<32x1xf32>
    %cst_9 = arith.constant 3.200000e+01 : f32
    %8 = vector.broadcast %cst_9 : f32 to vector<32x1xf32>
    %9 = arith.divf %7, %8 : vector<32x1xf32>
    %10 = vector.broadcast %9 : vector<32x1xf32> to vector<32x32xf32>
    %11 = arith.subf %1, %10 : vector<32x32xf32>
    %12 = arith.mulf %11, %11 : vector<32x32xf32>
    %cst_10 = arith.constant dense<0.000000e+00> : vector<32xf32>
    %13 = vector.multi_reduction <add>, %12, %cst_10 [1] : vector<32x32xf32> to vector<32xf32>
    %14 = vector.shape_cast %13 : vector<32xf32> to vector<32x1xf32>
    %cst_11 = arith.constant 3.200000e+01 : f32
    %15 = vector.broadcast %cst_11 : f32 to vector<32x1xf32>
    %16 = arith.divf %14, %15 : vector<32x1xf32>
    %17 = vector.broadcast %9 : vector<32x1xf32> to vector<32x32xf32>
    %18 = arith.subf %1, %17 : vector<32x32xf32>
    %cst_12 = arith.constant 9.99999974E-6 : f32
    %19 = vector.broadcast %cst_12 : f32 to vector<32x1xf32>
    %20 = arith.addf %16, %19 : vector<32x1xf32>
    %21 = math.rsqrt %20 : vector<32x1xf32>
    %22 = vector.broadcast %21 : vector<32x1xf32> to vector<32x32xf32>
    %23 = arith.mulf %18, %22 : vector<32x32xf32>
    %24 = vector.broadcast %4 : vector<1x32xf32> to vector<32x32xf32>
    %25 = arith.mulf %23, %24 : vector<32x32xf32>
    %26 = vector.broadcast %5 : vector<1x32xf32> to vector<32x32xf32>
    %27 = arith.addf %25, %26 : vector<32x32xf32>
    %c0_13 = arith.constant 0 : index
    %c0_14 = arith.constant 0 : index
    %28 = vector.load %arg5[%c0_13, %c0_14] : memref<1x32xf32, #tpu.memory_space<vmem>>, vector<1x32xf32>
    %c0_15 = arith.constant 0 : index
    %c0_16 = arith.constant 0 : index
    %29 = vector.load %arg6[%c0_15, %c0_16] : memref<1x32xf32, #tpu.memory_space<vmem>>, vector<1x32xf32>
    %cst_17 = arith.constant dense<0.000000e+00> : vector<16xf32>
    %30 = vector.multi_reduction <add>, %3, %cst_17 [1] : vector<16x32xf32> to vector<16xf32>
    %31 = vector.shape_cast %30 : vector<16xf32> to vector<16x1xf32>
    %cst_18 = arith.constant 3.200000e+01 : f32
    %32 = vector.broadcast %cst_18 : f32 to vector<16x1xf32>
    %33 = arith.divf %31, %32 : vector<16x1xf32>
    %34 = vector.broadcast %33 : vector<16x1xf32> to vector<16x32xf32>
    %35 = arith.subf %3, %34 : vector<16x32xf32>
    %36 = arith.mulf %35, %35 : vector<16x32xf32>
    %cst_19 = arith.constant dense<0.000000e+00> : vector<16xf32>
    %37 = vector.multi_reduction <add>, %36, %cst_19 [1] : vector<16x32xf32> to vector<16xf32>
    %38 = vector.shape_cast %37 : vector<16xf32> to vector<16x1xf32>
    %cst_20 = arith.constant 3.200000e+01 : f32
    %39 = vector.broadcast %cst_20 : f32 to vector<16x1xf32>
    %40 = arith.divf %38, %39 : vector<16x1xf32>
    %41 = vector.broadcast %33 : vector<16x1xf32> to vector<16x32xf32>
    %42 = arith.subf %3, %41 : vector<16x32xf32>
    %cst_21 = arith.constant 9.99999974E-6 : f32
    %43 = vector.broadcast %cst_21 : f32 to vector<16x1xf32>
    %44 = arith.addf %40, %43 : vector<16x1xf32>
    %45 = math.rsqrt %44 : vector<16x1xf32>
    %46 = vector.broadcast %45 : vector<16x1xf32> to vector<16x32xf32>
    %47 = arith.mulf %42, %46 : vector<16x32xf32>
    %48 = vector.broadcast %28 : vector<1x32xf32> to vector<16x32xf32>
    %49 = arith.mulf %47, %48 : vector<16x32xf32>
    %50 = vector.broadcast %29 : vector<1x32xf32> to vector<16x32xf32>
    %51 = arith.addf %49, %50 : vector<16x32xf32>
    %52 = arith.truncf %27 : vector<32x32xf32> to vector<32x32xbf16>
    %53 = arith.truncf %51 : vector<16x32xf32> to vector<16x32xbf16>
    %c0_22 = arith.constant 0 : index
    %c0_23 = arith.constant 0 : index
    %54 = vector.load %arg7[%c0_22, %c0_23] : memref<32x32xbf16, #tpu.memory_space<vmem>>, vector<32x32xbf16>
    %c0_24 = arith.constant 0 : index
    %c0_25 = arith.constant 0 : index
    %55 = vector.load %arg8[%c0_24, %c0_25] : memref<32x32xbf16, #tpu.memory_space<vmem>>, vector<32x32xbf16>
    %c0_26 = arith.constant 0 : index
    %c0_27 = arith.constant 0 : index
    %56 = vector.load %arg9[%c0_26, %c0_27] : memref<32x32xbf16, #tpu.memory_space<vmem>>, vector<32x32xbf16>
    %c0_28 = arith.constant 0 : index
    %c0_29 = arith.constant 0 : index
    %57 = vector.load %arg10[%c0_28, %c0_29] : memref<32x32xbf16, #tpu.memory_space<vmem>>, vector<32x32xbf16>
    %cst_30 = arith.constant dense<0.000000e+00> : vector<16x32xf32>
    %58 = tpu.matmul %53, %54, %cst_30 {dimension_numbers = #tpu.dot_dimension_numbers<[1], [0], [0], [1], [0, 0, 1, 1], [], []>} : vector<16x32xbf16>, vector<32x32xbf16>, vector<16x32xf32> -> vector<16x32xf32>
    %cst_31 = arith.constant 0.353553385 : f32
    %59 = vector.broadcast %cst_31 : f32 to vector<16x32xf32>
    %60 = arith.mulf %58, %59 : vector<16x32xf32>
    %cst_32 = arith.constant dense<0.000000e+00> : vector<32x32xf32>
    %61 = tpu.matmul %52, %55, %cst_32 {dimension_numbers = #tpu.dot_dimension_numbers<[1], [0], [0], [1], [0, 0, 1, 1], [], []>} : vector<32x32xbf16>, vector<32x32xbf16>, vector<32x32xf32> -> vector<32x32xf32>
    %cst_33 = arith.constant dense<0.000000e+00> : vector<32x32xf32>
    %62 = tpu.matmul %52, %56, %cst_33 {dimension_numbers = #tpu.dot_dimension_numbers<[1], [0], [0], [1], [0, 0, 1, 1], [], []>} : vector<32x32xbf16>, vector<32x32xbf16>, vector<32x32xf32> -> vector<32x32xf32>
    %cst_34 = arith.constant dense<0.000000e+00> : vector<16x32xf32>
    %63 = tpu.matmul %53, %55, %cst_34 {dimension_numbers = #tpu.dot_dimension_numbers<[1], [0], [0], [1], [0, 0, 1, 1], [], []>} : vector<16x32xbf16>, vector<32x32xbf16>, vector<16x32xf32> -> vector<16x32xf32>
    %cst_35 = arith.constant dense<0.000000e+00> : vector<16x32xf32>
    %64 = tpu.matmul %53, %56, %cst_35 {dimension_numbers = #tpu.dot_dimension_numbers<[1], [0], [0], [1], [0, 0, 1, 1], [], []>} : vector<16x32xbf16>, vector<32x32xbf16>, vector<16x32xf32> -> vector<16x32xf32>
    %65 = vector.extract_strided_slice %60 {offsets = [0, 0], sizes = [8, 32], strides = [1, 1]} : vector<16x32xf32> to vector<8x32xf32>
    %66 = arith.truncf %65 : vector<8x32xf32> to vector<8x32xbf16>
    %67 = vector.shape_cast %66 : vector<8x32xbf16> to vector<8x4x8xbf16>
    %68 = vector.extract_strided_slice %61 {offsets = [0, 0], sizes = [16, 32], strides = [1, 1]} : vector<32x32xf32> to vector<16x32xf32>
    %69 = vector.extract_strided_slice %63 {offsets = [0, 0], sizes = [8, 32], strides = [1, 1]} : vector<16x32xf32> to vector<8x32xf32>
    %70 = tpu.concatenate %68, %69 in 0 : vector<16x32xf32>, vector<8x32xf32> -> vector<24x32xf32>
    %71 = vector.extract_strided_slice %62 {offsets = [0, 0], sizes = [16, 32], strides = [1, 1]} : vector<32x32xf32> to vector<16x32xf32>
    %72 = vector.extract_strided_slice %64 {offsets = [0, 0], sizes = [8, 32], strides = [1, 1]} : vector<16x32xf32> to vector<8x32xf32>
    %73 = tpu.concatenate %71, %72 in 0 : vector<16x32xf32>, vector<8x32xf32> -> vector<24x32xf32>
    %74 = arith.truncf %70 : vector<24x32xf32> to vector<24x32xbf16>
    %75 = vector.shape_cast %74 : vector<24x32xbf16> to vector<24x4x8xbf16>
    %76 = arith.truncf %73 : vector<24x32xf32> to vector<24x32xbf16>
    %77 = vector.shape_cast %76 : vector<24x32xbf16> to vector<24x4x8xbf16>
    "tpu.trace_start"() <{level = 10 : i32, message = "qhd,khd->hqk"}> : () -> ()
    %cst_36 = arith.constant dense<0.000000e+00> : vector<4x8x24xf32>
    %78 = tpu.matmul %67, %75, %cst_36 {dimension_numbers = #tpu.dot_dimension_numbers<[2], [2], [0], [0], [0, 1, 0, 0, 1, 0], [1], [1]>} : vector<8x4x8xbf16>, vector<24x4x8xbf16>, vector<4x8x24xf32> -> vector<4x8x24xf32>
    "tpu.trace_stop"() : () -> ()
    %cst_37 = arith.constant dense<0xFF800000> : vector<4x8xf32>
    %79 = vector.multi_reduction <maximumf>, %78, %cst_37 [2] : vector<4x8x24xf32> to vector<4x8xf32>
    %80 = vector.shape_cast %79 : vector<4x8xf32> to vector<4x8x1xf32>
    %81 = vector.broadcast %80 : vector<4x8x1xf32> to vector<4x8x24xf32>
    %82 = arith.subf %78, %81 : vector<4x8x24xf32>
    %83 = math.exp %82 : vector<4x8x24xf32>
    %cst_38 = arith.constant dense<0.000000e+00> : vector<4x8xf32>
    %84 = vector.multi_reduction <add>, %83, %cst_38 [2] : vector<4x8x24xf32> to vector<4x8xf32>
    %85 = vector.shape_cast %84 : vector<4x8xf32> to vector<4x8x1xf32>
    %86 = tpu.reciprocal %85 {approx = true} : vector<4x8x1xf32> -> vector<4x8x1xf32>
    %87 = vector.broadcast %86 : vector<4x8x1xf32> to vector<4x8x24xf32>
    %88 = arith.mulf %83, %87 : vector<4x8x24xf32>
    %89 = arith.truncf %88 : vector<4x8x24xf32> to vector<4x8x24xbf16>
    "tpu.trace_start"() <{level = 10 : i32, message = "hqk,khd->qhd"}> : () -> ()
    %cst_39 = arith.constant dense<0.000000e+00> : vector<4x8x8xf32>
    %90 = tpu.matmul %77, %89, %cst_39 {dimension_numbers = #tpu.dot_dimension_numbers<[0], [2], [2], [1], [0, 1, 0, 2, 1, 1], [1], [0]>} : vector<24x4x8xbf16>, vector<4x8x24xbf16>, vector<4x8x8xf32> -> vector<4x8x8xf32>
    %91 = tpu.transpose %90, [2, 0, 1] : vector<4x8x8xf32> -> vector<8x4x8xf32>
    "tpu.trace_stop"() : () -> ()
    %92 = vector.shape_cast %91 : vector<8x4x8xf32> to vector<8x32xf32>
    %93 = vector.extract_strided_slice %60 {offsets = [8, 0], sizes = [8, 32], strides = [1, 1]} : vector<16x32xf32> to vector<8x32xf32>
    %94 = arith.truncf %93 : vector<8x32xf32> to vector<8x32xbf16>
    %95 = vector.shape_cast %94 : vector<8x32xbf16> to vector<8x4x8xbf16>
    %96 = vector.extract_strided_slice %61 {offsets = [16, 0], sizes = [16, 32], strides = [1, 1]} : vector<32x32xf32> to vector<16x32xf32>
    %97 = vector.extract_strided_slice %63 {offsets = [8, 0], sizes = [8, 32], strides = [1, 1]} : vector<16x32xf32> to vector<8x32xf32>
    %98 = tpu.concatenate %96, %97 in 0 : vector<16x32xf32>, vector<8x32xf32> -> vector<24x32xf32>
    %99 = vector.extract_strided_slice %62 {offsets = [16, 0], sizes = [16, 32], strides = [1, 1]} : vector<32x32xf32> to vector<16x32xf32>
    %100 = vector.extract_strided_slice %64 {offsets = [8, 0], sizes = [8, 32], strides = [1, 1]} : vector<16x32xf32> to vector<8x32xf32>
    %101 = tpu.concatenate %99, %100 in 0 : vector<16x32xf32>, vector<8x32xf32> -> vector<24x32xf32>
    %102 = arith.truncf %98 : vector<24x32xf32> to vector<24x32xbf16>
    %103 = vector.shape_cast %102 : vector<24x32xbf16> to vector<24x4x8xbf16>
    %104 = arith.truncf %101 : vector<24x32xf32> to vector<24x32xbf16>
    %105 = vector.shape_cast %104 : vector<24x32xbf16> to vector<24x4x8xbf16>
    "tpu.trace_start"() <{level = 10 : i32, message = "qhd,khd->hqk"}> : () -> ()
    %cst_40 = arith.constant dense<0.000000e+00> : vector<4x8x24xf32>
    %106 = tpu.matmul %95, %103, %cst_40 {dimension_numbers = #tpu.dot_dimension_numbers<[2], [2], [0], [0], [0, 1, 0, 0, 1, 0], [1], [1]>} : vector<8x4x8xbf16>, vector<24x4x8xbf16>, vector<4x8x24xf32> -> vector<4x8x24xf32>
    "tpu.trace_stop"() : () -> ()
    %cst_41 = arith.constant dense<0xFF800000> : vector<4x8xf32>
    %107 = vector.multi_reduction <maximumf>, %106, %cst_41 [2] : vector<4x8x24xf32> to vector<4x8xf32>
    %108 = vector.shape_cast %107 : vector<4x8xf32> to vector<4x8x1xf32>
    %109 = vector.broadcast %108 : vector<4x8x1xf32> to vector<4x8x24xf32>
    %110 = arith.subf %106, %109 : vector<4x8x24xf32>
    %111 = math.exp %110 : vector<4x8x24xf32>
    %cst_42 = arith.constant dense<0.000000e+00> : vector<4x8xf32>
    %112 = vector.multi_reduction <add>, %111, %cst_42 [2] : vector<4x8x24xf32> to vector<4x8xf32>
    %113 = vector.shape_cast %112 : vector<4x8xf32> to vector<4x8x1xf32>
    %114 = tpu.reciprocal %113 {approx = true} : vector<4x8x1xf32> -> vector<4x8x1xf32>
    %115 = vector.broadcast %114 : vector<4x8x1xf32> to vector<4x8x24xf32>
    %116 = arith.mulf %111, %115 : vector<4x8x24xf32>
    %117 = arith.truncf %116 : vector<4x8x24xf32> to vector<4x8x24xbf16>
    "tpu.trace_start"() <{level = 10 : i32, message = "hqk,khd->qhd"}> : () -> ()
    %cst_43 = arith.constant dense<0.000000e+00> : vector<4x8x8xf32>
    %118 = tpu.matmul %105, %117, %cst_43 {dimension_numbers = #tpu.dot_dimension_numbers<[0], [2], [2], [1], [0, 1, 0, 2, 1, 1], [1], [0]>} : vector<24x4x8xbf16>, vector<4x8x24xbf16>, vector<4x8x8xf32> -> vector<4x8x8xf32>
    %119 = tpu.transpose %118, [2, 0, 1] : vector<4x8x8xf32> -> vector<8x4x8xf32>
    "tpu.trace_stop"() : () -> ()
    %120 = vector.shape_cast %119 : vector<8x4x8xf32> to vector<8x32xf32>
    %121 = tpu.concatenate %92, %120 in 0 : vector<8x32xf32>, vector<8x32xf32> -> vector<16x32xf32>
    %122 = arith.truncf %121 : vector<16x32xf32> to vector<16x32xbf16>
    %cst_44 = arith.constant dense<0.000000e+00> : vector<16x32xf32>
    %123 = tpu.matmul %122, %57, %cst_44 {dimension_numbers = #tpu.dot_dimension_numbers<[1], [0], [0], [1], [0, 0, 1, 1], [], []>} : vector<16x32xbf16>, vector<32x32xbf16>, vector<16x32xf32> -> vector<16x32xf32>
    %124 = vector.shape_cast %123 : vector<16x32xf32> to vector<2x8x32xf32>
    %c0_45 = arith.constant 0 : index
    %c0_46 = arith.constant 0 : index
    %c0_47 = arith.constant 0 : index
    %125 = vector.load %arg11[%c0_45, %c0_46, %c0_47] : memref<2x8x32xf32, #tpu.memory_space<vmem>>, vector<2x8x32xf32>
    tpu.vector_store %arg11[%c0_45, %c0_46, %c0_47], %124 {strides = array<i32>} : memref<2x8x32xf32, #tpu.memory_space<vmem>>, vector<2x8x32xf32>,
    return
  }
  func.func @transform_0(%arg0: i32) -> (i32, i32, i32) {
    %c0_i32 = arith.constant 0 : i32
    %c0_i32_0 = arith.constant 0 : i32
    %c0_i32_1 = arith.constant 0 : i32
    return %arg0, %c0_i32, %c0_i32_0 : i32, i32, i32
  }
  func.func @transform_1(%arg0: i32) -> (i32, i32, i32) {
    %c0_i32 = arith.constant 0 : i32
    %c0_i32_0 = arith.constant 0 : i32
    %c0_i32_1 = arith.constant 0 : i32
    return %arg0, %c0_i32, %c0_i32_0 : i32, i32, i32
  }
  func.func @transform_2(%arg0: i32) -> (i32, i32) {
    %c0_i32 = arith.constant 0 : i32
    %c0_i32_0 = arith.constant 0 : i32
    %c0_i32_1 = arith.constant 0 : i32
    return %c0_i32, %c0_i32_0 : i32, i32
  }
  func.func @transform_3(%arg0: i32) -> (i32, i32) {
    %c0_i32 = arith.constant 0 : i32
    %c0_i32_0 = arith.constant 0 : i32
    %c0_i32_1 = arith.constant 0 : i32
    return %c0_i32, %c0_i32_0 : i32, i32
  }
  func.func @transform_4(%arg0: i32) -> (i32, i32) {
    %c0_i32 = arith.constant 0 : i32
    %c0_i32_0 = arith.constant 0 : i32
    %c0_i32_1 = arith.constant 0 : i32
    return %c0_i32, %c0_i32_0 : i32, i32
  }
  func.func @transform_5(%arg0: i32) -> (i32, i32) {
    %c0_i32 = arith.constant 0 : i32
    %c0_i32_0 = arith.constant 0 : i32
    %c0_i32_1 = arith.constant 0 : i32
    return %c0_i32, %c0_i32_0 : i32, i32
  }
  func.func @transform_6(%arg0: i32) -> (i32, i32) {
    %c0_i32 = arith.constant 0 : i32
    %c0_i32_0 = arith.constant 0 : i32
    %c0_i32_1 = arith.constant 0 : i32
    return %c0_i32, %c0_i32_0 : i32, i32
  }
  func.func @transform_7(%arg0: i32) -> (i32, i32) {
    %c0_i32 = arith.constant 0 : i32
    %c0_i32_0 = arith.constant 0 : i32
    %c0_i32_1 = arith.constant 0 : i32
    return %c0_i32, %c0_i32_0 : i32, i32
  }
  func.func @transform_8(%arg0: i32) -> (i32, i32) {
    %c0_i32 = arith.constant 0 : i32
    %c0_i32_0 = arith.constant 0 : i32
    %c0_i32_1 = arith.constant 0 : i32
    return %c0_i32, %c0_i32_0 : i32, i32
  }
  func.func @transform_9(%arg0: i32) -> (i32, i32) {
    %c0_i32 = arith.constant 0 : i32
    %c0_i32_0 = arith.constant 0 : i32
    %c0_i32_1 = arith.constant 0 : i32
    return %c0_i32, %c0_i32_0 : i32, i32
  }
  func.func @transform_10(%arg0: i32) -> (i32, i32, i32) {
    %c0_i32 = arith.constant 0 : i32
    %c0_i32_0 = arith.constant 0 : i32
    %c0_i32_1 = arith.constant 0 : i32
    return %arg0, %c0_i32, %c0_i32_0 : i32, i32, i32
  }
}

</mosaic_0001>

<bundles_post_ra>
// kernel: tpu_custom_call.1
= control target key start
LH: loop header
LB: loop body
LE: loop exit
PB: predicated region body
PF: predicated region fallthrough
CT: control target
= control target key end

     0   :  { %15 = vsyncpa [#allocation3], 0  ;;  %s3575_s0 = inlined_call_operand.hbm [shape: f32[2,16,32], index: 0, kind: input, shape index: {}]   ;;  %s3576_s1 = inlined_call_operand.hbm [shape: f32[2,8,32], index: 1, kind: input, shape index: {}]   ;;  %s3577_s2 = inlined_call_operand.hbm [shape: f32[1,32], index: 2, kind: input, shape index: {}]   ;;  %s3578_s3 = inlined_call_operand.hbm [shape: f32[1,32], index: 3, kind: input, shape index: {}]   ;;  %s3579_s4 = inlined_call_operand.hbm [shape: f32[1,32], index: 4, kind: input, shape index: {}]   ;;  %s3580_s5 = inlined_call_operand.hbm [shape: f32[1,32], index: 5, kind: input, shape index: {}]   ;;  %s3581_s6 = inlined_call_operand.hbm [shape: bf16[32,32], index: 6, kind: input, shape index: {}]   ;;  %s3582_s7 = inlined_call_operand.hbm [shape: bf16[32,32], index: 7, kind: input, shape index: {}]   ;;  %s3583_s8 = inlined_call_operand.hbm [shape: bf16[32,32], index: 8, kind: input, shape index: {}]   ;;  %s3584_s9 = inlined_call_operand.hbm [shape: bf16[32,32], index: 9, kind: input, shape index: {}]   ;;  %s3585_s10 = inlined_call_operand.hbm [shape: f32[2,8,32], index: 10, kind: output, shape index: {}]  }
   0x1   :  { %16 = vsyncpa [#allocation6], 0 }
   0x2   :  { %17 = vsyncpa [#allocation9], 0 }
   0x3   :  { %18 = vsyncpa [#allocation12], 0 }
   0x4   :  { %19 = vsyncpa [#allocation15], 0 }
   0x5   :  { %20 = vsyncpa [#allocation18], 0 }
   0x6   :  { %21 = vsyncpa [#allocation4], 0  ;;  %s2997_s13 = smov [#allocation5]   ;;  %s2998_s15 = smov [#allocation8]  }
   0x7   :  { %s39_s14 = sshll.u32 %s2997_s13, 4  ;;  %s62_s16 = sshll.u32 %s2998_s15, 4  ;;  %s40_s14 = int_to_ptr.vmem [resolvable:$true] %s39_s14  ;;  %s3076_s16 = int_to_ptr.vmem [resolvable:$true] %s62_s16 }
   0x8   :  { %s2741_s19 = scalar_lea.hbm %s3576_s1, 256 }
   0x9   :  { %p2742_p0 = scmp.ne.s32.totalorder %s3576_s1, %s2741_s19  ;;  %p2745_p1 = scmp.lt.u32.totalorder %s2741_s19, %s3576_s1 }
   0xb   :  { %p2747_p2 = pnand %p2745_p1, %p2742_p0 }
   0xd   :  { %2750 = shalt.err (!%p2747_p2)
}
   0xe   :  { %s2751_s24 = scalar_lea.vmem %s40_s14, 256  ;;  %p2756_p4 = scmp.lt.s32.totalorder %s40_s14, %s40_s14 }
   0xf   :  { %p2752_p3 = scmp.ne.s32.totalorder %s40_s14, %s2751_s24  ;;  %p2757_p5 = scmp.lt.s32.totalorder %s2751_s24, %s2751_s24 }
  0x11   :  { %p2758_p6 = por %p2757_p5, %p2756_p4 }
  0x13   :  { %p2759_p7 = pnand %p2758_p6, %p2752_p3 }
  0x15   :  { %2762 = shalt.err (!%p2759_p7)
}
  0x16   :  { %s2999_s25 = smov 128   ;;  %s3000_s26 = smov 8  }
  0x17   :  { %45 = dma.hbm_to_vmem [thread:$0]  %s3576_s1, 256, %s40_s14, [#allocation6], %s2999_s25, %s2999_s25, %s3000_s26  }
  0x18   :  { %s2763_s11 = scalar_lea.hbm %s3578_s3, 16 }
  0x19   :  { %p2764_p8 = scmp.ne.s32.totalorder %s3578_s3, %s2763_s11  ;;  %p2767_p9 = scmp.lt.u32.totalorder %s2763_s11, %s3578_s3 }
  0x1b   :  { %p2769_p10 = pnand %p2767_p9, %p2764_p8 }
  0x1d   :  { %2772 = shalt.err (!%p2769_p10)
}
  0x1e   :  { %s2773_s18 = scalar_lea.vmem %s3076_s16, 16  ;;  %s2777_s1 = scalar_lea.vmem %s3076_s16, 32 }
  0x1f   :  { %p2774_p11 = scmp.ne.s32.totalorder %s3076_s16, %s2773_s18  ;;  %p2778_p12 = scmp.lt.s32.totalorder %s3076_s16, %s3076_s16 }
  0x20   :  { %p2779_p13 = scmp.lt.s32.totalorder %s2777_s1, %s2773_s18 }
  0x22   :  { %p2780_p0 = por %p2779_p13, %p2778_p12 }
  0x24   :  { %p2781_p1 = pnand %p2780_p0, %p2774_p11 }
  0x26   :  { %2784 = shalt.err (!%p2781_p1)
}
  0x27   :  { %65 = dma.hbm_to_vmem [thread:$0]  %s3578_s3, 16, %s3076_s16, [#allocation9]  }
  0x28   :  { %s3001_s20 = smov [#allocation11]   ;;  %s2785_s24 = scalar_lea.hbm %s3580_s5, 16 }
  0x29   :  { %s82_s21 = sshll.u32 %s3001_s20, 4  ;;  %p2786_p2 = scmp.ne.s32.totalorder %s3580_s5, %s2785_s24  ;;  %s83_s21 = int_to_ptr.vmem [resolvable:$true] %s82_s21 }
  0x2a   :  { %p2789_p3 = scmp.lt.u32.totalorder %s2785_s24, %s3580_s5 }
  0x2c   :  { %p2791_p4 = pnand %p2789_p3, %p2786_p2 }
  0x2e   :  { %2794 = shalt.err (!%p2791_p4)
}
  0x2f   :  { %s2795_s11 = scalar_lea.vmem %s83_s21, 16  ;;  %s2799_s3 = scalar_lea.vmem %s83_s21, 32 }
  0x30   :  { %p2796_p5 = scmp.ne.s32.totalorder %s83_s21, %s2795_s11  ;;  %p2800_p6 = scmp.lt.s32.totalorder %s83_s21, %s83_s21 }
  0x31   :  { %p2801_p7 = scmp.lt.s32.totalorder %s2799_s3, %s2795_s11 }
  0x33   :  { %p2802_p8 = por %p2801_p7, %p2800_p6 }
  0x35   :  { %p2803_p9 = pnand %p2802_p8, %p2796_p5 }
  0x37   :  { %2806 = shalt.err (!%p2803_p9)
}
  0x38   :  { %85 = dma.hbm_to_vmem [thread:$0]  %s3580_s5, 16, %s83_s21, [#allocation12]  }
  0x39   :  { %s3002_s13 = smov [#allocation14]   ;;  %s3003_s17 = smov [#allocation2]  }
  0x3a   :  { %s103_s15 = sshll.u32 %s3002_s13, 4  ;;  %s27_s18 = sshll.u32 %s3003_s17, 4  ;;  %s104_s15 = int_to_ptr.vmem [resolvable:$true] %s103_s15  ;;  %s28_s18 = int_to_ptr.vmem [resolvable:$true] %s27_s18 }
  0x3b   :  { %s2807_s19 = scalar_lea.hbm %s3582_s7, 256 }
  0x3c   :  { %p2808_p10 = scmp.ne.s32.totalorder %s3582_s7, %s2807_s19  ;;  %p2811_p11 = scmp.lt.u32.totalorder %s2807_s19, %s3582_s7 }
  0x3e   :  { %p2813_p12 = pnand %p2811_p11, %p2808_p10 }
  0x40   :  { %2816 = shalt.err (!%p2813_p12)
}
  0x41   :  { %s2817_s5 = scalar_lea.vmem %s104_s15, 256  ;;  %p2822_p0 = scmp.lt.s32.totalorder %s104_s15, %s104_s15 }
  0x42   :  { %p2818_p13 = scmp.ne.s32.totalorder %s104_s15, %s2817_s5  ;;  %p2823_p1 = scmp.lt.s32.totalorder %s2817_s5, %s2817_s5 }
  0x44   :  { %p2824_p2 = por %p2823_p1, %p2822_p0 }
  0x46   :  { %p2825_p3 = pnand %p2824_p2, %p2818_p13 }
  0x48   :  { %2828 = shalt.err (!%p2825_p3)
}
  0x49   :  { %s3004_s21 = smov 64   ;;  %s3005_s27 = smov 4  }
  0x4a   :  { %109 = dma.hbm_to_vmem [thread:$0]  %s3582_s7, 256, %s104_s15, [#allocation15], %s3004_s21, %s3004_s21, %s3005_s27  }
  0x4b   :  { %s2829_s3 = scalar_lea.hbm %s3575_s0, 512 }
  0x4c   :  { %p2830_p4 = scmp.ne.s32.totalorder %s3575_s0, %s2829_s3  ;;  %p2833_p5 = scmp.lt.u32.totalorder %s2829_s3, %s3575_s0 }
  0x4e   :  { %p2835_p6 = pnand %p2833_p5, %p2830_p4 }
  0x50   :  { %2838 = shalt.err (!%p2835_p6)
}
  0x51   :  { %s2839_s1 = scalar_lea.vmem %s28_s18, 512  ;;  %p2844_p8 = scmp.lt.s32.totalorder %s28_s18, %s28_s18 }
  0x52   :  { %p2840_p7 = scmp.ne.s32.totalorder %s28_s18, %s2839_s1  ;;  %p2845_p9 = scmp.lt.s32.totalorder %s2839_s1, %s2839_s1 }
  0x54   :  { %p2846_p10 = por %p2845_p9, %p2844_p8 }
  0x56   :  { %p2847_p11 = pnand %p2846_p10, %p2840_p7 }
  0x58   :  { %2850 = shalt.err (!%p2847_p11)
}
  0x59   :  { %33 = dma.hbm_to_vmem [thread:$0]  %s3575_s0, 512, %s28_s18, [#allocation3], %s2999_s25, %s2999_s25, %s3000_s26  }
  0x5a   :  { %s3006_s14 = smov [#allocation7]   ;;  %s3007_s20 = smov [#allocation10]  }
  0x5b   :  { %s52_s19 = sshll.u32 %s3006_s14, 4  ;;  %s72_s22 = sshll.u32 %s3007_s20, 4  ;;  %s53_s19 = int_to_ptr.vmem [resolvable:$true] %s52_s19  ;;  %s73_s22 = int_to_ptr.vmem [resolvable:$true] %s72_s22 }
  0x5c   :  { %s2851_s5 = scalar_lea.hbm %s3577_s2, 16 }
  0x5d   :  { %p2852_p12 = scmp.ne.s32.totalorder %s3577_s2, %s2851_s5  ;;  %p2855_p13 = scmp.lt.u32.totalorder %s2851_s5, %s3577_s2 }
  0x5f   :  { %p2857_p0 = pnand %p2855_p13, %p2852_p12 }
  0x61   :  { %2860 = shalt.err (!%p2857_p0)
}
  0x62   :  { %s2861_s0 = scalar_lea.vmem %s53_s19, 16  ;;  %s2865_s18 = scalar_lea.vmem %s53_s19, 32 }
  0x63   :  { %p2862_p1 = scmp.ne.s32.totalorder %s53_s19, %s2861_s0  ;;  %p2866_p2 = scmp.lt.s32.totalorder %s53_s19, %s53_s19 }
  0x64   :  { %p2867_p3 = scmp.lt.s32.totalorder %s2865_s18, %s2861_s0 }
  0x66   :  { %p2868_p4 = por %p2867_p3, %p2866_p2 }
  0x68   :  { %p2869_p5 = pnand %p2868_p4, %p2862_p1 }
  0x6a   :  { %2872 = shalt.err (!%p2869_p5)
}
  0x6b   :  { %55 = dma.hbm_to_vmem [thread:$0]  %s3577_s2, 16, %s53_s19, [#allocation6]  }
  0x6c   :  { %s2873_s17 = scalar_lea.hbm %s3579_s4, 16 }
  0x6d   :  { %p2874_p6 = scmp.ne.s32.totalorder %s3579_s4, %s2873_s17  ;;  %p2877_p7 = scmp.lt.u32.totalorder %s2873_s17, %s3579_s4 }
  0x6f   :  { %p2879_p8 = pnand %p2877_p7, %p2874_p6 }
  0x71   :  { %2882 = shalt.err (!%p2879_p8)
}
  0x72   :  { %s2883_s20 = scalar_lea.vmem %s73_s22, 16  ;;  %s2887_s23 = scalar_lea.vmem %s73_s22, 32 }
  0x73   :  { %p2884_p9 = scmp.ne.s32.totalorder %s73_s22, %s2883_s20  ;;  %p2888_p10 = scmp.lt.s32.totalorder %s73_s22, %s73_s22 }
  0x74   :  { %p2889_p11 = scmp.lt.s32.totalorder %s2887_s23, %s2883_s20 }
  0x76   :  { %p2890_p12 = por %p2889_p11, %p2888_p10 }
  0x78   :  { %p2891_p13 = pnand %p2890_p12, %p2884_p9 }
  0x7a   :  { %2894 = shalt.err (!%p2891_p13)
}
  0x7b   :  { %75 = dma.hbm_to_vmem [thread:$0]  %s3579_s4, 16, %s73_s22, [#allocation9]  }
  0x7c   :  { %s3008_s24 = smov [#allocation13]   ;;  %s3009_s28 = smov [#allocation16]  }
  0x7d   :  { %s91_s5 = sshll.u32 %s3008_s24, 4  ;;  %s115_s29 = sshll.u32 %s3009_s28, 4  ;;  %s92_s5 = int_to_ptr.vmem [resolvable:$true] %s91_s5  ;;  %s116_s29 = int_to_ptr.vmem [resolvable:$true] %s115_s29 }
  0x7e   :  { %s2895_s0 = scalar_lea.hbm %s3581_s6, 256 }
  0x7f   :  { %p2896_p0 = scmp.ne.s32.totalorder %s3581_s6, %s2895_s0  ;;  %p2899_p1 = scmp.lt.u32.totalorder %s2895_s0, %s3581_s6 }
  0x81   :  { %p2901_p2 = pnand %p2899_p1, %p2896_p0 }
  0x83   :  { %2904 = shalt.err (!%p2901_p2)
}
  0x84   :  { %s2905_s4 = scalar_lea.vmem %s92_s5, 256  ;;  %p2910_p4 = scmp.lt.s32.totalorder %s92_s5, %s92_s5 }
  0x85   :  { %p2906_p3 = scmp.ne.s32.totalorder %s92_s5, %s2905_s4  ;;  %p2911_p5 = scmp.lt.s32.totalorder %s2905_s4, %s2905_s4 }
  0x87   :  { %p2912_p6 = por %p2911_p5, %p2910_p4 }
  0x89   :  { %p2913_p7 = pnand %p2912_p6, %p2906_p3 }
  0x8b   :  { %2916 = shalt.err (!%p2913_p7)
}
  0x8c   :  { %97 = dma.hbm_to_vmem [thread:$0]  %s3581_s6, 256, %s92_s5, [#allocation12], %s3004_s21, %s3004_s21, %s3005_s27  }
  0x8d   :  { %s2917_s7 = scalar_lea.hbm %s3583_s8, 256 }
  0x8e   :  { %p2918_p8 = scmp.ne.s32.totalorder %s3583_s8, %s2917_s7  ;;  %p2921_p9 = scmp.lt.u32.totalorder %s2917_s7, %s3583_s8 }
  0x90   :  { %p2923_p10 = pnand %p2921_p9, %p2918_p8 }
  0x92   :  { %2926 = shalt.err (!%p2923_p10)
}
  0x93   :  { %s2927_s2 = scalar_lea.vmem %s116_s29, 256  ;;  %p2932_p12 = scmp.lt.s32.totalorder %s116_s29, %s116_s29 }
  0x94   :  { %p2928_p11 = scmp.ne.s32.totalorder %s116_s29, %s2927_s2  ;;  %p2933_p13 = scmp.lt.s32.totalorder %s2927_s2, %s2927_s2 }
  0x96   :  { %p2934_p0 = por %p2933_p13, %p2932_p12 }
  0x98   :  { %p2935_p1 = pnand %p2934_p0, %p2928_p11 }
  0x9a   :  { %2938 = shalt.err (!%p2935_p1)
}
  0x9b   :  { %121 = dma.hbm_to_vmem [thread:$0]  %s3583_s8, 256, %s116_s29, [#allocation15], %s3004_s21, %s3004_s21, %s3005_s27  }
  0x9c   :  { %s3010_s24 = smov [#allocation17]   ;;  %s2939_s11 = scalar_lea.hbm %s3584_s9, 256 }
  0x9d   :  { %s127_s5 = sshll.u32 %s3010_s24, 4  ;;  %p2940_p2 = scmp.ne.s32.totalorder %s3584_s9, %s2939_s11  ;;  %s128_s5 = int_to_ptr.vmem [resolvable:$true] %s127_s5 }
  0x9e   :  { %p2943_p3 = scmp.lt.u32.totalorder %s2939_s11, %s3584_s9 }
  0xa0   :  { %p2945_p4 = pnand %p2943_p3, %p2940_p2 }
  0xa2   :  { %2948 = shalt.err (!%p2945_p4)
}
  0xa3   :  { %s2949_s12 = scalar_lea.vmem %s128_s5, 256  ;;  %p2954_p6 = scmp.lt.s32.totalorder %s128_s5, %s128_s5 }
  0xa4   :  { %p2950_p5 = scmp.ne.s32.totalorder %s128_s5, %s2949_s12  ;;  %p2955_p7 = scmp.lt.s32.totalorder %s2949_s12, %s2949_s12 }
  0xa6   :  { %p2956_p8 = por %p2955_p7, %p2954_p6 }
  0xa8   :  { %p2957_p9 = pnand %p2956_p8, %p2950_p5 }
  0xaa   :  { %2960 = shalt.err (!%p2957_p9)
}
  0xab   :  { %133 = dma.hbm_to_vmem [thread:$0]  %s3584_s9, 256, %s128_s5, [#allocation18], %s3004_s21, %s3004_s21, %s3005_s27  }
  0xac   :  { %2983 = dma.done.wait [#allocation3], 512  }
  0xad   :  { %2984 = vsyncadd [#allocation3], 4294966784 }
  0xae   :  { %2985 = dma.done.wait [#allocation6], 272  }
  0xaf   :  { %2986 = vsyncadd [#allocation6], 4294967024 }
  0xb0   :  { %2987 = dma.done.wait [#allocation9], 32  }
  0xb1   :  { %2988 = vsyncadd [#allocation9], 4294967264 }
  0xb2   :  { %2989 = dma.done.wait [#allocation12], 272  }
  0xb3   :  { %2990 = vsyncadd [#allocation12], 4294967024 }
  0xb4   :  { %2991 = dma.done.wait [#allocation15], 512  }
  0xb5   :  { %2992 = vsyncadd [#allocation15], 4294966784 }
  0xb6   :  { %2993 = dma.done.wait [#allocation18], 256  }
  0xb7   :  { %2994 = vsyncadd [#allocation18], 4294967040  ;;  %vm173_vm0 = vcmask 261120   ;;  %v165_v0 = vld [vmem:[#allocation2] sm:$0xff]  ;;  %v167_v1 = vld [vmem:[#allocation2 + $0x10] sm:$0xff]  ;;  %v3011_v45 = vmov 0.0  }
  0xb8   :  { %v166_v2 = vld [vmem:[#allocation2 + $0x8] sm:$0xff]  ;;  %v174_v3 = vsel %vm173_vm0, %v165_v0, 0.0  ;;  %v180_v4 = vsel %vm173_vm0, %v167_v1, 0.0  ;;  %v168_v5 = vld [vmem:[#allocation2 + $0x18] sm:$0xff]  ;;  %v169_v6 = vld [vmem:[#allocation5] sm:$0xff]  ;;  %2505 = vmatprep.subr.bf16.mxu0 %v3011_v45  ;;  %vm3012_vm1 = vmmov 0  }
  0xb9   :  { %v170_v7 = vld [vmem:[#allocation5 + $0x8] sm:$0xff]  ;;  %175 = vadd.xlane.f32.xlu0 %v174_v3  ;;  %181 = vadd.xlane.f32.xlu1 %v180_v4  ;;  %v177_v8 = vsel %vm173_vm0, %v166_v2, 0.0  ;;  %v183_v9 = vsel %vm173_vm0, %v168_v5, 0.0  ;;  %v249_v10 = vsel %vm173_vm0, %v169_v6, 0.0  ;;  %v3262_v43 = vld [vmem:[#allocation14 + $0x8] sm:$0xff]   ;;  %v2691_v44 = vld [vmem:[#allocation13] sm:$0xff]  }
  0xba   :  { %v252_v11 = vsel %vm173_vm0, %v170_v7, 0.0  ;;  %v3258_v42 = vld [vmem:[#allocation14] sm:$0xff]   ;;  %2506 = vmatpush3.bf16.msra.mxu0 %v2691_v44  ;;  %v2692_v46 = vld [vmem:[#allocation13 + $0x8] sm:$0xff]   ;;  %2509 = vmatprep.mubr.msk.bf16.mxu0 %vm3012_vm1, %v3011_v45  ;;  %v3271_v47 = vld [vmem:[#allocation16] sm:$0xff]   ;;  %s3013_s9 = smov 112   ;;  %s3014_s21 = smov 120  }
  0xbb   :  { %2513 = vmatprep.subr.bf16.mxu1 %v3258_v42  ;;  %2507 = vmatprep.subr.bf16.mxu0 %v3011_v45  ;;  %v2413_v4 = vld [vmem:[#allocation7] ss:$0 sm:$0xff]  ;;  %s3015_s27 = smov 104   ;;  %vm698_vm2 = vcmask 1043456   ;;  %vm694_vm3 = vcmask 64512   ;;  %vm880_vm4 = vcmask 195584  }
  0xbc   :  { %2514 = vmatpush3.bf16.msra.mxu1 %v3258_v42  ;;  %s3018_s4 = smov 16   ;;  %s3019_s22 = smov 24   ;;  %vm1454_vm5 = vcmask 130048  }
  0xbd   :  { %178 = vadd.xlane.f32.xlu0 %v177_v8  ;;  %184 = vadd.xlane.f32.xlu1 %v183_v9  ;;  %s3020_s13 = smov [#allocation19]  }
  0xbe   :  { %2515 = vmatprep.subr.bf16.mxu1 %v3262_v43  ;;  %2508 = vmatpush3.bf16.msra.mxu0 %v2692_v46  ;;  %s2396_s17 = sshll.u32 %s3020_s13, 4  ;;  %s2397_s17 = int_to_ptr.vmem [resolvable:$true] %s2396_s17 }
  0xbf   :  { %2521 = vmatprep.subr.bf16.mxu0 %v3271_v47  ;;  %s2961_s1 = scalar_lea.vmem %s2397_s17, 256  ;;  %p2966_p11 = scmp.lt.s32.totalorder %s2397_s17, %s2397_s17 }
  0xc0   :  { %2516 = vmatpush3.bf16.msra.mxu1 %v3262_v43  ;;  %p2962_p10 = scmp.ne.s32.totalorder %s2397_s17, %s2961_s1  ;;  %p2967_p12 = scmp.lt.s32.totalorder %s2961_s1, %s2961_s1 }
  0xc1   :  { %250 = vadd.xlane.f32.xlu0 %v249_v10  ;;  %253 = vadd.xlane.f32.xlu1 %v252_v11  ;;  %v2414_v10 = vld [vmem:[#allocation8] ss:$0 sm:$0xff] }
  0xc2   :  { %2529 = vmatprep.subr.bf16.mxu1 %v3011_v45  ;;  %p2968_p13 = por %p2967_p12, %p2966_p11 }
  0xc4   :  { %p2969_p0 = pnand %p2968_p13, %p2962_p10 }
 0x146   :  { %v176_v12 = vpop.xlane.xlu0 %175  ;;  %v182_v13 = vpop.xlane.xlu1 %181 }
 0x147   :  { %v187_v14 = vmul.f32 0.03125, %v176_v12  ;;  %v189_v15 = vmul.f32 0.03125, %v182_v13 }
 0x149   :  { %v3228_v16 = vsub.f32 %v165_v0, %v187_v14  ;;  %v3230_v17 = vsub.f32 %v167_v1, %v189_v15 }
 0x14a   :  { %v179_v18 = vpop.xlane.xlu0 %178  ;;  %v185_v19 = vpop.xlane.xlu1 %184 }
 0x14b   :  { %v188_v20 = vmul.f32 0.03125, %v179_v18  ;;  %v190_v21 = vmul.f32 0.03125, %v185_v19  ;;  %v195_v22 = vmul.f32 %v3228_v16, %v3228_v16  ;;  %v197_v23 = vmul.f32 %v3230_v17, %v3230_v17 }
 0x14d   :  { %v3236_v24 = vsub.f32 %v166_v2, %v188_v20  ;;  %v3238_v25 = vsub.f32 %v168_v5, %v190_v21  ;;  %v199_v26 = vsel %vm173_vm0, %v195_v22, 0.0  ;;  %v205_v29 = vsel %vm173_vm0, %v197_v23, 0.0  ;;  %v2415_v20 = vld [vmem:[#allocation10] ss:$0 sm:$0xff] }
 0x14e   :  { %200 = vadd.xlane.f32.xlu0 %v199_v26  ;;  %v251_v27 = vpop.xlane.xlu0 %250  ;;  %v254_v28 = vpop.xlane.xlu1 %253 }
 0x14f   :  { %v255_v30 = vmul.f32 0.03125, %v251_v27  ;;  %v256_v31 = vmul.f32 0.03125, %v254_v28  ;;  %v196_v32 = vmul.f32 %v3236_v24, %v3236_v24  ;;  %v198_v33 = vmul.f32 %v3238_v25, %v3238_v25  ;;  %v2416_v28 = vld [vmem:[#allocation11] ss:$0 sm:$0xff] }
 0x151   :  { %v3246_v34 = vsub.f32 %v169_v6, %v255_v30  ;;  %v3248_v35 = vsub.f32 %v170_v7, %v256_v31  ;;  %v202_v36 = vsel %vm173_vm0, %v196_v32, 0.0  ;;  %v208_v37 = vsel %vm173_vm0, %v198_v33, 0.0  ;;  %v2694_v33 = vld [vmem:[#allocation16 + $0x8] sm:$0xff]  }
 0x152   :  { %206 = vadd.xlane.f32.xlu0 %v205_v29  ;;  %203 = vadd.xlane.f32.xlu1 %v202_v36 }
 0x153   :  { %v259_v38 = vmul.f32 %v3246_v34, %v3246_v34  ;;  %v260_v39 = vmul.f32 %v3248_v35, %v3248_v35 }
 0x155   :  { %v261_v40 = vsel %vm173_vm0, %v259_v38, 0.0  ;;  %v264_v41 = vsel %vm173_vm0, %v260_v39, 0.0 }
 0x156   :  { %209 = vadd.xlane.f32.xlu1 %v208_v37  ;;  %262 = vadd.xlane.f32.xlu0 %v261_v40 }
 0x15a   :  { %265 = vadd.xlane.f32.xlu1 %v264_v41 }
 0x1db   :  { %v201_v48 = vpop.xlane.xlu0 %200 }
 0x1dc   :  { %v211_v49 = vmul.f32 0.03125, %v201_v48 }
 0x1de   :  { %v215_v50 = vadd.f32 1e-05, %v211_v49 }
 0x1df   :  { %v204_v51 = vpop.xlane.xlu1 %203  ;;  %v207_v52 = vpop.xlane.xlu0 %206 }
 0x1e0   :  { %2697 = vrsqrt.f32 %v215_v50  ;;  %v212_v53 = vmul.f32 0.03125, %v204_v51  ;;  %v213_v54 = vmul.f32 0.03125, %v207_v52 }
 0x1e2   :  { %v216_v55 = vadd.f32 1e-05, %v212_v53  ;;  %v217_v56 = vadd.f32 1e-05, %v213_v54 }
 0x1e3   :  { %v210_v57 = vpop.xlane.xlu1 %209  ;;  %v263_v58 = vpop.xlane.xlu0 %262 }
 0x1e4   :  { %2699 = vrsqrt.f32 %v216_v55  ;;  %v214_v59 = vmul.f32 0.03125, %v210_v57  ;;  %v267_v60 = vmul.f32 0.03125, %v263_v58 }
 0x1e5   :  { %2701 = vrsqrt.f32 %v217_v56 }
 0x1e6   :  { %v218_v61 = vadd.f32 1e-05, %v214_v59  ;;  %v269_v62 = vadd.f32 1e-05, %v267_v60 }
 0x1e7   :  { %v266_v63 = vpop.xlane.xlu1 %265 }
 0x1e8   :  { %2703 = vrsqrt.f32 %v218_v61  ;;  %v268_v0 = vmul.f32 0.03125, %v266_v63 }
 0x1e9   :  { %2705 = vrsqrt.f32 %v269_v62 }
 0x1ea   :  { %v2698_v1 = vpop.eup %2697  ;;  %v270_v2 = vadd.f32 1e-05, %v268_v0 }
 0x1eb   :  { %v223_v3 = vmul.f32 %v2698_v1, %v3228_v16 }
 0x1ec   :  { %2707 = vrsqrt.f32 %v270_v2 }
 0x1ed   :  { %v233_v8 = vmul.f32 %v2413_v4, %v223_v3 }
 0x1ee   :  { %v2700_v5 = vpop.eup %2699 }
 0x1ef   :  { %v2702_v6 = vpop.eup %2701  ;;  %v224_v7 = vmul.f32 %v2700_v5, %v3236_v24  ;;  %v243_v15 = vadd.f32 %v2414_v10, %v233_v8 }
 0x1f0   :  { %v225_v9 = vmul.f32 %v2702_v6, %v3230_v17 }
 0x1f1   :  { %v234_v11 = vmul.f32 %v2413_v4, %v224_v7 }
 0x1f2   :  { %v2704_v12 = vpop.eup %2703  ;;  %v235_v19 = vmul.f32 %v2413_v4, %v225_v9 }
 0x1f3   :  { %v2706_v13 = vpop.eup %2705  ;;  %v226_v14 = vmul.f32 %v2704_v12, %v3238_v25  ;;  %v244_v18 = vadd.f32 %v2414_v10, %v234_v11 }
 0x1f4   :  { %v273_v16 = vmul.f32 %v2706_v13, %v3246_v34  ;;  %v245_v17 = vadd.f32 %v2414_v10, %v235_v19 }
 0x1f5   :  { %v291_v21 = vpack.c.bf16 %v244_v18, %v243_v15  ;;  %v236_v22 = vmul.f32 %v2413_v4, %v226_v14 }
 0x1f6   :  { %v2708_v23 = vpop.eup %2707  ;;  %v281_v27 = vmul.f32 %v2415_v20, %v273_v16 }
 0x1f7   :  { %v274_v24 = vmul.f32 %v2708_v23, %v3248_v35  ;;  %2517 = vmatprep.mubr.msk.bf16.mxu1 %vm173_vm0, %v291_v21  ;;  %v246_v26 = vadd.f32 %v2414_v10, %v236_v22 }
 0x1f8   :  { %v289_v25 = vadd.f32 %v2416_v28, %v281_v27 }
 0x1f9   :  { %v292_v29 = vpack.c.bf16 %v246_v26, %v245_v17  ;;  %v282_v30 = vmul.f32 %v2415_v20, %v274_v24 }
 0x1fb   :  { %2518 = vmatmul.mubr.msk.bf16.vlgmr.msra.gmra.mrb[0].mxu1 %vm173_vm0, %v292_v29  ;;  %v290_v31 = vadd.f32 %v2416_v28, %v282_v30 }
 0x1fc   :  { %2530 = vmatpush3.bf16.msra.mxu1 %v3258_v42  ;;  %2533 = vmatprep.mubr.msk.bf16.mxu1 %vm3012_vm1, %v3011_v45 }
 0x1fd   :  { %v293_v32 = vpack.c.bf16 %v290_v31, %v289_v25  ;;  %2531 = vmatprep.subr.bf16.mxu1 %v3011_v45 }
 0x1ff   :  { %2510 = vmatmul.mubr.msk.bf16.vlgmr.msra.gmra.mrb[0].mxu0 %vm173_vm0, %v293_v32 }
 0x200   :  { %2522 = vmatpush3.bf16.msra.mxu0 %v3271_v47  ;;  %2525 = vmatprep.mubr.msk.bf16.mxu0 %vm173_vm0, %v291_v21 }
 0x201   :  { %2532 = vmatpush3.bf16.msra.mxu1 %v3262_v43  ;;  %2523 = vmatprep.subr.bf16.mxu0 %v2694_v33 }
 0x202   :  { %2545 = vmatprep.subr.bf16.mxu1 %v3011_v45 }
 0x204   :  { %2534 = vmatmul.mubr.msk.bf16.vlgmr.msra.gmra.mrb[4].mxu1 %vm173_vm0, %v293_v32  ;;  %2524 = vmatpush3.bf16.msra.mxu0 %v2694_v33 }
 0x205   :  { %2537 = vmatprep.subr.bf16.mxu0 %v3011_v45  ;;  %2547 = vmatprep.mubr.msk.bf16.mxu1 %vm3012_vm1, %v3011_v45 }
 0x207   :  { %2526 = vmatmul.mubr.msk.bf16.vlgmr.msra.gmra.mrb[4].mxu0 %vm173_vm0, %v292_v29 }
 0x208   :  { %2538 = vmatpush3.bf16.msra.mxu0 %v3271_v47  ;;  %2541 = vmatprep.mubr.msk.bf16.mxu0 %vm3012_vm1, %v3011_v45 }
 0x209   :  { %2539 = vmatprep.subr.bf16.mxu0 %v3011_v45 }
 0x20c   :  { %2540 = vmatpush3.bf16.msra.mxu0 %v2694_v33 }
 0x20d   :  { %2551 = vmatprep.subr.bf16.mxu0 %v3011_v45 }
 0x20f   :  { %2542 = vmatmul.mubr.msk.bf16.vlgmr.msra.gmra.mrb[8].mxu0 %vm173_vm0, %v293_v32 }
 0x210   :  { %2553 = vmatprep.mubr.msk.bf16.mxu0 %vm3012_vm1, %v3011_v45 }
 0x2ce   :  { %v2519_v34 = vpop.f32.mrb[0].mxu1 }
 0x2cf   :  { %v420_v35 = vpop.f32.mrb[1].mxu1 }
 0x2d0   :  { %v2520_v36 = vpop.f32.mrb[2].mxu1 }
 0x2d1   :  { %v3304_v37 = vpack.c.bf16 %v2520_v36, %v2519_v34  ;;  %v423_v38 = vpop.f32.mrb[3].mxu1 }
 0x2d2   :  { %v586_v39 = vpack.c.bf16 %v423_v38, %v420_v35  ;;  %v359_v40 = vpop.f32.mrb[0].mxu0 }
 0x2d3   :  { %v2511_v41 = vpop.f32.mrb[1].mxu0  ;;  %v366_v46 = vmul.f32 0.35355338, %v359_v40 }
 0x2d4   :  { %596 = vrot.lane.b32.xlu1 %v586_v39, %s3013_s9  ;;  %590 = vrot.lane.b32.xlu0 %v586_v39, %s3014_s21  ;;  %v3308_v42 = vpop.f32.mrb[2].mxu0 }
 0x2d5   :  { %v2512_v43 = vpop.f32.mrb[3].mxu0  ;;  %v578_v53 = vpack.c.bf16 %v366_v46, %v366_v46  ;;  %v367_v38 = vmul.f32 0.35355338, %v3308_v42 }
 0x2d7   :  { %v530_v44 = vpop.f32.mrb[4].mxu1  ;;  %v3373_v40 = vpack.c.bf16 %v367_v38, %v367_v38 }
 0x2d8   :  { %v587_v47 = vpack.c.bf16 %v530_v44, %v530_v44  ;;  %v2535_v48 = vpop.f32.mrb[5].mxu1 }
 0x2d9   :  { %v3310_v49 = vpop.f32.mrb[6].mxu1 }
 0x2da   :  { %598 = vrot.lane.b32.xlu0 %v587_v47, %s3013_s9  ;;  %592 = vrot.lane.b32.xlu1 %v587_v47, %s3014_s21  ;;  %v2536_v50 = vpop.f32.mrb[7].mxu1  ;;  %v2527_v51 = vpop.f32.mrb[4].mxu0 }
 0x2db   :  { %v481_v52 = vpop.f32.mrb[5].mxu0 }
 0x2dc   :  { %v2528_v54 = vpop.f32.mrb[6].mxu0 }
 0x2dd   :  { %v3314_v55 = vpack.c.bf16 %v2528_v54, %v2527_v51  ;;  %v484_v56 = vpop.f32.mrb[7].mxu0 }
 0x2de   :  { %602 = vrot.lane.b32.xlu1 %v586_v39, %s3015_s27  ;;  %580 = vrot.lane.b32.xlu0 %v578_v53, %s3014_s21  ;;  %v3318_v57 = vpack.c.bf16 %v484_v56, %v481_v52 }
 0x2e2   :  { %604 = vrot.lane.b32.xlu1 %v587_v47, %s3015_s27  ;;  %584 = vrot.lane.b32.xlu0 %v578_v53, %s3015_s27  ;;  %v3322_v58 = vpop.f32.mrb[8].mxu0 }
 0x2e3   :  { %v2543_v59 = vpop.f32.mrb[9].mxu0  ;;  %v609_v36 = vpack.c.bf16 %v3322_v58, %v3322_v58 }
 0x2e4   :  { %v3324_v60 = vpop.f32.mrb[10].mxu0 }
 0x2e5   :  { %v2544_v61 = vpop.f32.mrb[11].mxu0 }
 0x2e6   :  { %582 = vrot.lane.b32.xlu1 %v578_v53, %s3013_s9 }
 0x309   :  { %630 = vxpose.xlu1.c.b16.start [1/2] (short) (narrow) %v586_v39, 16  ;;  %v3369_v39 = vpack.c.bf16 %v3310_v49, %v3310_v49 }
 0x30d   :  { %631 = vxpose.xlu1.c.b16.end [2/2] (short) (narrow) %v587_v47, 16 }
 0x346   :  { %v597_v62 = vpop.permute.xlu1 %596  ;;  %v591_v63 = vpop.permute.xlu0 %590 }
 0x347   :  { %646 = vxpose.xlu0.c.b16.start [1/2] (short) (narrow) %v591_v63, 16 }
 0x34c   :  { %v593_v0 = vpop.permute.xlu1 %592  ;;  %v599_v2 = vpop.permute.xlu0 %598 }
 0x34d   :  { %647 = vxpose.xlu0.c.b16.end [2/2] (short) (narrow) %v593_v0, 16 }
 0x350   :  { %v603_v1 = vpop.permute.xlu1 %602  ;;  %v581_v7 = vpop.permute.xlu0 %580 }
 0x351   :  { %678 = vxpose.xlu1.c.b16.start [1/2] (short) (narrow) %v603_v1, 16  ;;  %662 = vxpose.xlu0.c.b16.start [1/2] (short) (narrow) %v597_v62, 16 }
 0x354   :  { %v605_v3 = vpop.permute.xlu1 %604  ;;  %v585_v8 = vpop.permute.xlu0 %584 }
 0x355   :  { %679 = vxpose.xlu1.c.b16.end [2/2] (short) (narrow) %v605_v3, 16  ;;  %663 = vxpose.xlu0.c.b16.end [2/2] (short) (narrow) %v599_v2, 16 }
 0x358   :  { %v583_v4 = vpop.permute.xlu1 %582 }
 0x359   :  { %612 = vrot.lane.b32.xlu1 %v3318_v57, %s3014_s21 }
 0x36f   :  { %v638_v5 = vpop.trf.xlu1 }
 0x370   :  { %v700_v6 = vsel %vm698_vm2, %v638_v5, 0 }
 0x371   :  { %2546 = vmatpush3.bf16.msra.mxu1 %v700_v6 }
 0x372   :  { %2557 = vmatprep.subr.bf16.mxu1 %v3011_v45 }
 0x374   :  { %2548 = vmatmul.mubr.msk.bf16.vlgmr.msra.gmra.mrb[8].mxu1 %vm694_vm3, %v578_v53 }
 0x375   :  { %2559 = vmatprep.mubr.msk.bf16.mxu1 %vm3012_vm1, %v3011_v45 }
 0x3af   :  { %v654_v9 = vpop.trf.xlu0 }
 0x3b0   :  { %v746_v10 = vsel %vm698_vm2, %v654_v9, 0 }
 0x3b1   :  { %2552 = vmatpush3.bf16.msra.mxu0 %v746_v10 }
 0x3b2   :  { %2563 = vmatprep.subr.bf16.mxu0 %v3011_v45 }
 0x3b4   :  { %2554 = vmatmul.mubr.msk.bf16.vlgmr.msra.gmra.mrb[12].mxu0 %vm694_vm3, %v581_v7 }
 0x3b5   :  { %2565 = vmatprep.mubr.msk.bf16.mxu0 %vm3012_vm1, %v3011_v45 }
 0x3b7   :  { %v686_v11 = vpop.trf.xlu1  ;;  %v670_v12 = vpop.trf.xlu0 }
 0x3b8   :  { %v838_v13 = vsel %vm698_vm2, %v686_v11, 0  ;;  %v792_v14 = vsel %vm698_vm2, %v670_v12, 0 }
 0x3b9   :  { %2558 = vmatpush3.bf16.msra.mxu1 %v792_v14  ;;  %2564 = vmatpush3.bf16.msra.mxu0 %v838_v13 }
 0x3ba   :  { %2575 = vmatprep.subr.bf16.mxu0 %v3011_v45  ;;  %2569 = vmatprep.subr.bf16.mxu1 %v3011_v45 }
 0x3bc   :  { %2560 = vmatmul.mubr.msk.bf16.vlgmr.msra.gmra.mrb[12].mxu1 %vm694_vm3, %v583_v4  ;;  %2566 = vmatmul.mubr.msk.bf16.vlgmr.msra.gmra.mrb[16].mxu0 %vm694_vm3, %v585_v8 }
 0x3bd   :  { %2577 = vmatprep.mubr.msk.bf16.mxu0 %vm3012_vm1, %v3011_v45  ;;  %2571 = vmatprep.mubr.msk.bf16.mxu1 %vm3012_vm1, %v3011_v45 }
 0x3cb   :  { %v613_v35 = vpop.permute.xlu1 %612 }
 0x447   :  { %v3349_v15 = vpop.f32.mrb[8].mxu1 }
 0x448   :  { %v2549_v18 = vpop.f32.mrb[9].mxu1  ;;  %v881_v19 = vsel %vm880_vm4, %v3349_v15, -inf }
 0x449   :  { %v739_v16 = vpop.f32.mrb[10].mxu1  ;;  %882 = vmax.xlane.f32.xlu0 %v881_v19 }
 0x44a   :  { %v2550_v20 = vpop.f32.mrb[11].mxu1 }
 0x487   :  { %v782_v21 = vpop.f32.mrb[12].mxu0 }
 0x488   :  { %v2555_v22 = vpop.f32.mrb[13].mxu0  ;;  %v884_v23 = vsel %vm880_vm4, %v782_v21, -inf }
 0x489   :  { %885 = vmax.xlane.f32.xlu1 %v884_v23  ;;  %v785_v24 = vpop.f32.mrb[14].mxu0  ;;  %v3412_v23 = vpack.c.bf16 %v3324_v60, %v3324_v60 }
 0x48a   :  { %v2556_v17 = vpop.f32.mrb[15].mxu0 }
 0x48f   :  { %v828_v26 = vpop.f32.mrb[12].mxu1  ;;  %v874_v27 = vpop.f32.mrb[16].mxu0 }
 0x490   :  { %v2561_v28 = vpop.f32.mrb[13].mxu1  ;;  %v2567_v29 = vpop.f32.mrb[17].mxu0  ;;  %v887_v30 = vsel %vm880_vm4, %v828_v26, -inf  ;;  %v890_v34 = vsel %vm880_vm4, %v874_v27, -inf }
 0x491   :  { %v877_v25 = vpop.f32.mrb[18].mxu0  ;;  %888 = vmax.xlane.f32.xlu0 %v887_v30  ;;  %v831_v31 = vpop.f32.mrb[14].mxu1 }
 0x492   :  { %v2562_v32 = vpop.f32.mrb[15].mxu1  ;;  %v2568_v33 = vpop.f32.mrb[19].mxu0 }
 0x495   :  { %891 = vmax.xlane.f32.xlu0 %v890_v34 }
 0x4b6   :  { %945 = vxpose.xlu1.c.b16.start [1/2] (short) (narrow) %v613_v35, 16 }
 0x4c2   :  { %929 = vxpose.xlu0.c.b16.start [1/2] (short) (narrow) %v3318_v57, 16 }
 0x4c6   :  { %930 = vxpose.xlu0.c.b16.end [2/2] (short) (narrow) %v609_v36, 16 }
 0x4cf   :  { %614 = vrot.lane.b32.xlu0 %v609_v36, %s3014_s21 }
 0x4d3   :  { %624 = vrot.lane.b32.xlu0 %v3318_v57, %s3015_s27 }
 0x4d6   :  { %v883_v46 = vpop.xlane.xlu0 %882 }
 0x4d7   :  { %1469 = vrot.lane.b32.xlu0 %v3304_v37, %s3014_s21  ;;  %v893_v59 = vsub.f32 %v3349_v15, %v883_v46 }
 0x4d9   :  { %v897_v61 = vmul.f32 1.442695, %v893_v59 }
 0x4db   :  { %1481 = vrot.lane.b32.xlu0 %v3304_v37, %s3015_s27 }
 0x4df   :  { %1483 = vrot.lane.b32.xlu0 %v3369_v39, %s3015_s27 }
 0x4e3   :  { %1461 = vrot.lane.b32.xlu0 %v3373_v40, %s3013_s9 }
 0x516   :  { %v886_v41 = vpop.xlane.xlu1 %885 }
 0x517   :  { %v894_v43 = vsub.f32 %v782_v21, %v886_v41 }
 0x519   :  { %v899_v44 = vmul.f32 1.442695, %v894_v43 }
 0x51b   :  { %2709 = vpow2.f32 %v899_v44 }
 0x51e   :  { %v889_v47 = vpop.xlane.xlu0 %888 }
 0x51f   :  { %v895_v48 = vsub.f32 %v828_v26, %v889_v47 }
 0x522   :  { %v892_v42 = vpop.xlane.xlu0 %891 }
 0x523   :  { %v896_v50 = vsub.f32 %v874_v27, %v892_v42 }
 0x525   :  { %v2710_v51 = vpop.eup %2709  ;;  %v903_v49 = vmul.f32 1.442695, %v896_v50 }
 0x526   :  { %v908_v52 = vsel %vm880_vm4, %v2710_v51, 0.0 }
 0x527   :  { %2711 = vpow2.f32 %v903_v49  ;;  %909 = vadd.xlane.f32.xlu0 %v908_v52 }
 0x528   :  { %v3379_v56 = vpop.trf.xlu0  ;;  %2713 = vpow2.f32 %v897_v61 }
 0x531   :  { %v2712_v53 = vpop.eup %2711 }
 0x532   :  { %v914_v54 = vsel %vm880_vm4, %v2712_v53, 0.0  ;;  %v2714_v62 = vpop.eup %2713 }
 0x533   :  { %915 = vadd.xlane.f32.xlu0 %v914_v54  ;;  %v905_v63 = vsel %vm880_vm4, %v2714_v62, 0.0 }
 0x541   :  { %v615_v58 = vpop.permute.xlu0 %614 }
 0x542   :  { %946 = vxpose.xlu1.c.b16.end [2/2] (short) (narrow) %v615_v58, 16 }
 0x545   :  { %v625_v2 = vpop.permute.xlu0 %624 }
 0x546   :  { %618 = vrot.lane.b32.xlu1 %v3318_v57, %s3013_s9  ;;  %v901_v57 = vmul.f32 1.442695, %v895_v48 }
 0x548   :  { %2715 = vpow2.f32 %v901_v57 }
 0x549   :  { %v1470_v3 = vpop.permute.xlu0 %1469 }
 0x54a   :  { %620 = vrot.lane.b32.xlu1 %v609_v36, %s3013_s9 }
 0x54d   :  { %v1482_v4 = vpop.permute.xlu0 %1481 }
 0x54e   :  { %626 = vrot.lane.b32.xlu1 %v609_v36, %s3015_s27 }
 0x551   :  { %v1484_v5 = vpop.permute.xlu0 %1483 }
 0x552   :  { %1471 = vrot.lane.b32.xlu1 %v3369_v39, %s3014_s21  ;;  %v3395_v0 = vpop.eup %2715 }
 0x553   :  { %v911_v1 = vsel %vm880_vm4, %v3395_v0, 0.0 }
 0x555   :  { %v3401_v6 = vpop.permute.xlu0 %1461 }
 0x556   :  { %1475 = vrot.lane.b32.xlu1 %v3304_v37, %s3013_s9 }
 0x55a   :  { %1477 = vrot.lane.b32.xlu1 %v3369_v39, %s3013_s9 }
 0x55e   :  { %1459 = vrot.lane.b32.xlu1 %v3373_v40, %s3014_s21 }
 0x582   :  { %906 = vadd.xlane.f32.xlu1 %v905_v63 }
 0x586   :  { %912 = vadd.xlane.f32.xlu1 %v911_v1 }
 0x597   :  { %1463 = vrot.lane.b32.xlu1 %v3373_v40, %s3015_s27 }
 0x5a4   :  { %v953_v7 = vpop.trf.xlu1 }
 0x5b4   :  { %v910_v8 = vpop.xlane.xlu0 %909 }
 0x5b5   :  { %2717 = vrcp.f32 %v910_v8 }
 0x5b8   :  { %v619_v9 = vpop.permute.xlu1 %618 }
 0x5b9   :  { %961 = vxpose.xlu0.c.b16.start [1/2] (short) (narrow) %v619_v9, 16 }
 0x5ba   :  { %977 = vxpose.xlu1.c.b16.start [1/2] (short) (narrow) %v625_v2, 16 }
 0x5bc   :  { %v621_v10 = vpop.permute.xlu1 %620 }
 0x5bd   :  { %962 = vxpose.xlu0.c.b16.end [2/2] (short) (narrow) %v621_v10, 16 }
 0x5bf   :  { %v2718_v11 = vpop.eup %2717 }
 0x5c0   :  { %v627_v12 = vpop.permute.xlu1 %626  ;;  %v916_v13 = vpop.xlane.xlu0 %915  ;;  %v922_v14 = vmul.f32 %v2718_v11, %v2710_v51 }
 0x5c1   :  { %2719 = vrcp.f32 %v916_v13  ;;  %1509 = vxpose.xlu0.c.b16.start [1/2] (short) (narrow) %v3304_v37, 16  ;;  %978 = vxpose.xlu1.c.b16.end [2/2] (short) (narrow) %v627_v12, 16 }
 0x5c2   :  { %v926_v15 = vpack.c.bf16 %v922_v14, %v922_v14 }
 0x5c4   :  { %v1472_v18 = vpop.permute.xlu1 %1471  ;;  %v1043_v19 = vsel %vm880_vm4, %v926_v15, 0 }
 0x5c5   :  { %1510 = vxpose.xlu0.c.b16.end [2/2] (short) (narrow) %v3369_v39, 16  ;;  %2576 = vmatpush3.bf16.xpose.msra.mxu0 %v1043_v19 }
 0x5c6   :  { %2587 = vmatprep.subr.bf16.mxu0 %v3011_v45 }
 0x5c8   :  { %v1476_v16 = vpop.permute.xlu1 %1475 }
 0x5c9   :  { %1541 = vxpose.xlu1.c.b16.start [1/2] (short) (narrow) %v1476_v16, 16  ;;  %1525 = vxpose.xlu0.c.b16.start [1/2] (short) (narrow) %v1470_v3, 16 }
 0x5cb   :  { %v2720_v20 = vpop.eup %2719 }
 0x5cc   :  { %v1478_v21 = vpop.permute.xlu1 %1477  ;;  %2578 = vmatmul.mubr.msk.bf16.vlgmr.msra.gmra.mrb[20].mxu0 %vm880_vm4, %v953_v7  ;;  %v924_v22 = vmul.f32 %v2720_v20, %v2712_v53 }
 0x5cd   :  { %1542 = vxpose.xlu1.c.b16.end [2/2] (short) (narrow) %v1478_v21, 16  ;;  %1526 = vxpose.xlu0.c.b16.end [2/2] (short) (narrow) %v1472_v18, 16 }
 0x5ce   :  { %v928_v37 = vpack.c.bf16 %v924_v22, %v924_v22  ;;  %2589 = vmatprep.mubr.msk.bf16.mxu0 %vm3012_vm1, %v3011_v45 }
 0x5d0   :  { %v1135_v24 = vsel %vm880_vm4, %v928_v37, 0  ;;  %v1460_v17 = vpop.permute.xlu1 %1459 }
 0x5d1   :  { %1493 = vrot.lane.b32.xlu1 %v3412_v23, %s3014_s21  ;;  %1557 = vxpose.xlu0.c.b16.start [1/2] (short) (narrow) %v1482_v4, 16 }
 0x5d2   :  { %2588 = vmatpush3.bf16.xpose.msra.mxu0 %v1135_v24 }
 0x5d3   :  { %2599 = vmatprep.subr.bf16.mxu0 %v3011_v45 }
 0x5d5   :  { %1503 = vrot.lane.b32.xlu1 %v3314_v55, %s3015_s27  ;;  %1558 = vxpose.xlu0.c.b16.end [2/2] (short) (narrow) %v1484_v5, 16 }
 0x5d9   :  { %1805 = vxpose.xlu0.c.b16.start [1/2] (short) (narrow) %v3314_v55, 16 }
 0x5dd   :  { %1806 = vxpose.xlu0.c.b16.end [2/2] (short) (narrow) %v3412_v23, 16 }
 0x60f   :  { %v907_v60 = vpop.xlane.xlu1 %906 }
 0x610   :  { %2721 = vrcp.f32 %v907_v60 }
 0x613   :  { %v913_v26 = vpop.xlane.xlu1 %912 }
 0x614   :  { %2723 = vrcp.f32 %v913_v26 }
 0x617   :  { %v1464_v25 = vpop.permute.xlu1 %1463 }
 0x61a   :  { %v2722_v27 = vpop.eup %2721 }
 0x61b   :  { %v921_v28 = vmul.f32 %v2722_v27, %v2714_v62 }
 0x61d   :  { %v925_v29 = vpack.c.bf16 %v921_v28, %v921_v28 }
 0x61e   :  { %v2724_v30 = vpop.eup %2723 }
 0x61f   :  { %v997_v31 = vsel %vm880_vm4, %v925_v29, 0  ;;  %v923_v32 = vmul.f32 %v2724_v30, %v3395_v0  ;;  %v969_v33 = vpop.trf.xlu0 }
 0x620   :  { %2570 = vmatpush3.bf16.xpose.msra.mxu1 %v997_v31 }
 0x621   :  { %2581 = vmatprep.subr.bf16.mxu1 %v3011_v45  ;;  %v927_v34 = vpack.c.bf16 %v923_v32, %v923_v32 }
 0x623   :  { %v985_v35 = vpop.trf.xlu1  ;;  %v1089_v36 = vsel %vm880_vm4, %v927_v34, 0 }
 0x624   :  { %2590 = vmatmul.mubr.msk.bf16.vlgmr.msra.gmra.mrb[24].mxu0 %vm880_vm4, %v985_v35 }
 0x625   :  { %2601 = vmatprep.mubr.msk.bf16.mxu0 %vm3012_vm1, %v3011_v45 }
 0x627   :  { %2572 = vmatmul.mubr.msk.bf16.vlgmr.msra.gmra.mrb[16].mxu1 %vm880_vm4, %v3379_v56  ;;  %v1517_v38 = vpop.trf.xlu0 }
 0x628   :  { %2582 = vmatpush3.bf16.xpose.msra.mxu1 %v1089_v36  ;;  %2583 = vmatprep.mubr.msk.bf16.mxu1 %vm3012_vm1, %v3011_v45  ;;  %v1577_v39 = vsel %vm698_vm2, %v1517_v38, 0 }
 0x629   :  { %2593 = vmatprep.subr.bf16.mxu1 %v3011_v45 }
 0x62f   :  { %2584 = vmatmul.mubr.msk.bf16.vlgmr.msra.gmra.mrb[20].mxu1 %vm880_vm4, %v969_v33  ;;  %v1533_v41 = vpop.trf.xlu0  ;;  %v1549_v44 = vpop.trf.xlu1 }
 0x630   :  { %v1623_v43 = vsel %vm698_vm2, %v1533_v41, 0  ;;  %2594 = vmatpush3.bf16.msra.mxu1 %v1577_v39  ;;  %2595 = vmatprep.mubr.msk.bf16.mxu1 %vm3012_vm1, %v3011_v45  ;;  %v1669_v46 = vsel %vm698_vm2, %v1549_v44, 0 }
 0x631   :  { %2600 = vmatpush3.bf16.msra.mxu0 %v1623_v43  ;;  %2605 = vmatprep.subr.bf16.mxu1 %v3011_v45 }
 0x632   :  { %2611 = vmatprep.subr.bf16.mxu0 %v3011_v45 }
 0x634   :  { %2602 = vmatmul.mubr.msk.bf16.vlgmr.msra.gmra.mrb[28].mxu0 %vm694_vm3, %v1460_v17 }
 0x635   :  { %2613 = vmatprep.mubr.msk.bf16.mxu0 %vm3012_vm1, %v3011_v45 }
 0x637   :  { %2596 = vmatmul.mubr.msk.bf16.vlgmr.msra.gmra.mrb[24].mxu1 %vm694_vm3, %v3373_v40  ;;  %v1565_v47 = vpop.trf.xlu0 }
 0x638   :  { %v1715_v48 = vsel %vm698_vm2, %v1565_v47, 0  ;;  %2606 = vmatpush3.bf16.msra.mxu1 %v1669_v46  ;;  %2607 = vmatprep.mubr.msk.bf16.mxu1 %vm3012_vm1, %v3011_v45 }
 0x639   :  { %2612 = vmatpush3.bf16.msra.mxu0 %v1715_v48  ;;  %2617 = vmatprep.subr.bf16.mxu1 %v3011_v45 }
 0x63a   :  { %2623 = vmatprep.subr.bf16.mxu0 %v3011_v45 }
 0x63c   :  { %2614 = vmatmul.mubr.msk.bf16.vlgmr.msra.gmra.mrb[32].mxu0 %vm694_vm3, %v1464_v25 }
 0x63d   :  { %2625 = vmatprep.mubr.msk.bf16.mxu0 %vm3012_vm1, %v3011_v45 }
 0x63f   :  { %2608 = vmatmul.mubr.msk.bf16.vlgmr.msra.gmra.mrb[28].mxu1 %vm694_vm3, %v3401_v6  ;;  %v1813_v37 = vpop.trf.xlu0 }
 0x640   :  { %2619 = vmatprep.mubr.msk.bf16.mxu1 %vm3012_vm1, %v3011_v45 }
 0x643   :  { %v1494_v22 = vpop.permute.xlu1 %1493 }
 0x647   :  { %v1504_v24 = vpop.permute.xlu1 %1503 }
 0x69f   :  { %v3459_v40 = vpop.f32.mrb[20].mxu0 }
 0x6a0   :  { %v2579_v42 = vpop.f32.mrb[21].mxu0 }
 0x6a1   :  { %v1082_v50 = vpop.f32.mrb[22].mxu0 }
 0x6a2   :  { %v2580_v51 = vpop.f32.mrb[23].mxu0 }
 0x6f7   :  { %v3461_v49 = vpop.f32.mrb[24].mxu0 }
 0x6f8   :  { %v2591_v52 = vpop.f32.mrb[25].mxu0 }
 0x6f9   :  { %v1174_v53 = vpop.f32.mrb[26].mxu0 }
 0x6fa   :  { %v3463_v54 = vpop.f32.mrb[16].mxu1  ;;  %v2592_v56 = vpop.f32.mrb[27].mxu0 }
 0x6fb   :  { %v2573_v58 = vpop.f32.mrb[17].mxu1 }
 0x6fc   :  { %v1036_v59 = vpop.f32.mrb[18].mxu1 }
 0x6fd   :  { %v2574_v61 = vpop.f32.mrb[19].mxu1 }
 0x702   :  { %v3465_v57 = vpop.f32.mrb[20].mxu1 }
 0x703   :  { %v2585_v62 = vpop.f32.mrb[21].mxu1 }
 0x704   :  { %v1128_v63 = vpop.f32.mrb[22].mxu1 }
 0x705   :  { %v2586_v0 = vpop.f32.mrb[23].mxu1 }
 0x707   :  { %v1659_v1 = vpop.f32.mrb[28].mxu0 }
 0x708   :  { %v2603_v2 = vpop.f32.mrb[29].mxu0  ;;  %v1760_v3 = vsel %vm880_vm4, %v1659_v1, -inf }
 0x709   :  { %1761 = vmax.xlane.f32.xlu0 %v1760_v3  ;;  %v1662_v4 = vpop.f32.mrb[30].mxu0 }
 0x70a   :  { %v1613_v5 = vpop.f32.mrb[24].mxu1  ;;  %v2604_v6 = vpop.f32.mrb[31].mxu0 }
 0x70b   :  { %v2597_v7 = vpop.f32.mrb[25].mxu1  ;;  %v1757_v8 = vsel %vm880_vm4, %v1613_v5, -inf }
 0x70c   :  { %1758 = vmax.xlane.f32.xlu1 %v1757_v8  ;;  %v1616_v9 = vpop.f32.mrb[26].mxu1 }
 0x70d   :  { %v2598_v10 = vpop.f32.mrb[27].mxu1 }
 0x70f   :  { %v1751_v11 = vpop.f32.mrb[32].mxu0 }
 0x710   :  { %v2615_v12 = vpop.f32.mrb[33].mxu0  ;;  %v1766_v21 = vsel %vm880_vm4, %v1751_v11, -inf }
 0x711   :  { %v1754_v13 = vpop.f32.mrb[34].mxu0 }
 0x712   :  { %v1705_v14 = vpop.f32.mrb[28].mxu1  ;;  %v2616_v15 = vpop.f32.mrb[35].mxu0 }
 0x713   :  { %v2609_v18 = vpop.f32.mrb[29].mxu1  ;;  %v1763_v19 = vsel %vm880_vm4, %v1705_v14, -inf }
 0x714   :  { %1764 = vmax.xlane.f32.xlu1 %v1763_v19  ;;  %v1708_v16 = vpop.f32.mrb[30].mxu1 }
 0x715   :  { %v2610_v20 = vpop.f32.mrb[31].mxu1  ;;  %v3016_v16 = vmov 1983009808  }
 0x716   :  { %v1308_v20 = vunpack.c.l.s4 %v3016_v16 }
 0x718   :  { %1767 = vmax.xlane.f32.xlu1 %v1766_v21  ;;  %v1310_v21 = vlaneseq }
 0x71f   :  { %1491 = vrot.lane.b32.xlu0 %v3314_v55, %s3014_s21 }
 0x729   :  { %1499 = vrot.lane.b32.xlu1 %v3412_v23, %s3013_s9 }
 0x796   :  { %v1762_v17 = vpop.xlane.xlu0 %1761 }
 0x797   :  { %v1770_v60 = vsub.f32 %v1659_v1, %v1762_v17 }
 0x799   :  { %v1775_v26 = vmul.f32 1.442695, %v1770_v60  ;;  %v1759_v27 = vpop.xlane.xlu1 %1758 }
 0x79a   :  { %v1769_v28 = vsub.f32 %v1613_v5, %v1759_v27 }
 0x79b   :  { %2725 = vpow2.f32 %v1775_v26  ;;  %v3017_v26 = vmov 1934713408  }
 0x79c   :  { %v1773_v29 = vmul.f32 1.442695, %v1769_v28  ;;  %v1340_v27 = vunpack.c.l.s4 %v3017_v26 }
 0x79e   :  { %2727 = vpow2.f32 %v1773_v29 }
 0x7a1   :  { %v1765_v33 = vpop.xlane.xlu1 %1764 }
 0x7a2   :  { %v1771_v34 = vsub.f32 %v1705_v14, %v1765_v33 }
 0x7a4   :  { %v1777_v38 = vmul.f32 1.442695, %v1771_v34 }
 0x7a5   :  { %v2726_v30 = vpop.eup %2725  ;;  %v1768_v35 = vpop.xlane.xlu1 %1767 }
 0x7a6   :  { %v1784_v25 = vsel %vm880_vm4, %v2726_v30, 0.0  ;;  %v1772_v36 = vsub.f32 %v1751_v11, %v1768_v35  ;;  %2729 = vpow2.f32 %v1777_v38 }
 0x7a7   :  { %1785 = vadd.xlane.f32.xlu0 %v1784_v25 }
 0x7a8   :  { %v2728_v31 = vpop.eup %2727  ;;  %v1779_v39 = vmul.f32 1.442695, %v1772_v36 }
 0x7a9   :  { %v1781_v32 = vsel %vm880_vm4, %v2728_v31, 0.0 }
 0x7aa   :  { %1782 = vadd.xlane.f32.xlu1 %v1781_v32  ;;  %2731 = vpow2.f32 %v1779_v39 }
 0x7b0   :  { %v2730_v41 = vpop.eup %2729 }
 0x7b1   :  { %v1787_v44 = vsel %vm880_vm4, %v2730_v41, 0.0 }
 0x7b4   :  { %v2732_v43 = vpop.eup %2731 }
 0x7b5   :  { %v1790_v46 = vsel %vm880_vm4, %v2732_v43, 0.0 }
 0x7bb   :  { %1505 = vrot.lane.b32.xlu1 %v3412_v23, %s3015_s27  ;;  %v1492_v23 = vpop.permute.xlu0 %1491 }
 0x7bd   :  { %1497 = vrot.lane.b32.xlu0 %v3314_v55, %s3013_s9  ;;  %v1500_v55 = vpop.permute.xlu1 %1499 }
 0x7dc   :  { %1788 = vadd.xlane.f32.xlu0 %v1787_v44 }
 0x7df   :  { %1791 = vadd.xlane.f32.xlu1 %v1790_v46 }
 0x80c   :  { %1821 = vxpose.xlu1.c.b16.start [1/2] (short) (narrow) %v1492_v23, 16 }
 0x810   :  { %1822 = vxpose.xlu1.c.b16.end [2/2] (short) (narrow) %v1494_v22, 16  ;;  %v1309_v22 = vunpack.c.0.s8 %v1308_v20 }
 0x81a   :  { %1177 = vxpose.xlu1.b32.start.end [1/1] (short) (narrow) %v3463_v54, 8 }
 0x81e   :  { %1241 = vxpose.xlu1.b32.start.end [1/1] (short) (narrow) %v3465_v57, 8 }
 0x834   :  { %v1786_v47 = vpop.xlane.xlu0 %1785 }
 0x835   :  { %2733 = vrcp.f32 %v1786_v47 }
 0x837   :  { %v1783_v48 = vpop.xlane.xlu1 %1782 }
 0x838   :  { %2735 = vrcp.f32 %v1783_v48  ;;  %v1498_v42 = vpop.permute.xlu0 %1497 }
 0x839   :  { %1837 = vxpose.xlu0.c.b16.start [1/2] (short) (narrow) %v1498_v42, 16 }
 0x83b   :  { %v1506_v58 = vpop.permute.xlu1 %1505 }
 0x83d   :  { %1838 = vxpose.xlu0.c.b16.end [2/2] (short) (narrow) %v1500_v55, 16 }
 0x83f   :  { %v2734_v50 = vpop.eup %2733 }
 0x840   :  { %v1798_v51 = vmul.f32 %v2734_v50, %v2726_v30 }
 0x841   :  { %1853 = vxpose.xlu0.c.b16.start [1/2] (short) (narrow) %v1504_v24, 16 }
 0x842   :  { %v2736_v52 = vpop.eup %2735  ;;  %v1802_v53 = vpack.c.bf16 %v1798_v51, %v1798_v51 }
 0x843   :  { %v1797_v56 = vmul.f32 %v2736_v52, %v2728_v31  ;;  %v1341_v31 = vunpack.c.0.s8 %v1340_v27 }
 0x844   :  { %v1919_v59 = vsel %vm880_vm4, %v1802_v53, 0 }
 0x845   :  { %2624 = vmatpush3.bf16.xpose.msra.mxu0 %v1919_v59  ;;  %1854 = vxpose.xlu0.c.b16.end [2/2] (short) (narrow) %v1506_v58, 16  ;;  %v1801_v54 = vpack.c.bf16 %v1797_v56, %v1797_v56 }
 0x846   :  { %2635 = vmatprep.subr.bf16.mxu0 %v3011_v45 }
 0x847   :  { %v1873_v61 = vsel %vm880_vm4, %v1801_v54, 0 }
 0x848   :  { %2618 = vmatpush3.bf16.xpose.msra.mxu1 %v1873_v61 }
 0x849   :  { %1209 = vxpose.xlu0.b32.start.end [1/1] (short) (narrow) %v3459_v40, 8  ;;  %2629 = vmatprep.subr.bf16.mxu1 %v3011_v45 }
 0x84d   :  { %1273 = vxpose.xlu0.b32.start.end [1/1] (short) (narrow) %v3461_v49, 8 }
 0x84f   :  { %2620 = vmatmul.mubr.msk.bf16.vlgmr.msra.gmra.mrb[32].mxu1 %vm880_vm4, %v1813_v37  ;;  %v1311_v37 = vshrl.u32 %v1310_v21, 7 }
 0x850   :  { %2631 = vmatprep.mubr.msk.bf16.mxu1 %vm3012_vm1, %v3011_v45 }
 0x851   :  { %v3504_v60 = vsub.s32 %v1309_v22, %v1311_v37  ;;  %v3510_v36 = vsub.s32 %v1341_v31, %v1311_v37 }
 0x869   :  { %v1789_v57 = vpop.xlane.xlu0 %1788 }
 0x86a   :  { %2737 = vrcp.f32 %v1789_v57 }
 0x86c   :  { %v1792_v62 = vpop.xlane.xlu1 %1791 }
 0x86d   :  { %2739 = vrcp.f32 %v1792_v62 }
 0x872   :  { %v1829_v63 = vpop.trf.xlu1 }
 0x873   :  { %2626 = vmatmul.mubr.msk.bf16.vlgmr.msra.gmra.mrb[36].mxu0 %vm880_vm4, %v1829_v63 }
 0x874   :  { %v2738_v0 = vpop.eup %2737  ;;  %2637 = vmatprep.mubr.msk.bf16.mxu0 %vm3012_vm1, %v3011_v45 }
 0x875   :  { %v1799_v40 = vmul.f32 %v2738_v0, %v2730_v41 }
 0x877   :  { %v2740_v1 = vpop.eup %2739  ;;  %v1803_v2 = vpack.c.bf16 %v1799_v40, %v1799_v40 }
 0x878   :  { %v1800_v49 = vmul.f32 %v2740_v1, %v2732_v43 }
 0x879   :  { %v1965_v3 = vsel %vm880_vm4, %v1803_v2, 0 }
 0x87a   :  { %2630 = vmatpush3.bf16.xpose.msra.mxu1 %v1965_v3  ;;  %v1804_v4 = vpack.c.bf16 %v1800_v49, %v1800_v49 }
 0x87b   :  { %2641 = vmatprep.subr.bf16.mxu1 %v3011_v45 }
 0x87c   :  { %v2011_v5 = vsel %vm880_vm4, %v1804_v4, 0 }
 0x87d   :  { %2636 = vmatpush3.bf16.xpose.msra.mxu0 %v2011_v5 }
 0x89a   :  { %v1193_v18 = vpop.trf.xlu1 }
 0x89e   :  { %v1257_v24 = vpop.trf.xlu1 }
 0x89f   :  { %v1845_v6 = vpop.trf.xlu0  ;;  %v1305_v28 = vcombine.low %v1193_v18, %v1257_v24  ;;  %v1306_v29 = vcombine.high %v1193_v18, %v1257_v24 }
 0x8a0   :  { %2632 = vmatmul.mubr.msk.bf16.vlgmr.msra.gmra.mrb[36].mxu1 %vm880_vm4, %v1845_v6 }
 0x8a1   :  { %2645 = vmatprep.mubr.msk.bf16.mxu1 %vm3012_vm1, %v3011_v45  ;;  %v1313_v32 = vrot.slane %v1305_v28, %v3504_v60  ;;  %v1320_v33 = vrot.slane %v1306_v29, %v3504_v60 }
 0x8a7   :  { %v1861_v7 = vpop.trf.xlu0 }
 0x8a8   :  { %2638 = vmatmul.mubr.msk.bf16.vlgmr.msra.gmra.mrb[40].mxu0 %vm880_vm4, %v1861_v7 }
 0x8c9   :  { %v1225_v19 = vpop.trf.xlu0 }
 0x8cd   :  { %v1289_v17 = vpop.trf.xlu0 }
 0x8ce   :  { %v1321_v30 = vcombine.low %v1225_v19, %v1289_v17  ;;  %v1322_v25 = vcombine.high %v1225_v19, %v1289_v17 }
 0x8d0   :  { %v1329_v34 = vrot.slane %v1321_v30, %v3504_v60  ;;  %v1336_v35 = vrot.slane %v1322_v25, %v3504_v60  ;;  %v2695_v25 = vld [vmem:[#allocation17] sm:$0xff]  }
 0x8d1   :  { %2642 = vmatpush3.bf16.msra.mxu1 %v2695_v25 }
 0x8d2   :  { %v1337_v38 = vcombine.low %v1313_v32, %v1329_v34  ;;  %v1338_v39 = vcombine.high %v1313_v32, %v1329_v34  ;;  %v1353_v41 = vcombine.low %v1320_v33, %v1336_v35  ;;  %v1354_v43 = vcombine.high %v1320_v33, %v1336_v35  ;;  %2643 = vmatprep.subr.bf16.mxu1 %v3011_v45 }
 0x8d4   :  { %v1345_v44 = vrot.slane %v1337_v38, %v3510_v36  ;;  %v1352_v46 = vrot.slane %v1338_v39, %v3510_v36  ;;  %v1361_v23 = vrot.slane %v1353_v41, %v3510_v36  ;;  %v1368_v55 = vrot.slane %v1354_v43, %v3510_v36 }
 0x8d6   :  { %v1373_v51 = vcombine.low %v1345_v44, %v1352_v46  ;;  %v2438_v52 = vcombine.high %v1345_v44, %v1352_v46  ;;  %v1389_v53 = vcombine.low %v1361_v23, %v1368_v55  ;;  %v2439_v56 = vcombine.high %v1361_v23, %v1368_v55  ;;  %v2696_v46 = vld [vmem:[#allocation17 + $0x8] sm:$0xff]  }
 0x8d7   :  { %2644 = vmatpush3.bf16.msra.mxu1 %v2696_v46 }
 0x8d8   :  { %v1380_v58 = vrot.slane %v1373_v51, %v3504_v60  ;;  %v1388_v59 = vrot.slane %v2438_v52, %v3504_v60  ;;  %v1396_v54 = vrot.slane %v1389_v53, %v3504_v60  ;;  %v1404_v61 = vrot.slane %v2439_v56, %v3504_v60 }
 0x8da   :  { %v1405_v40 = vcombine.low %v1380_v58, %v1388_v59  ;;  %v1421_v1 = vcombine.low %v1396_v54, %v1404_v61  ;;  %v1406_v17 = vcombine.high %v1380_v58, %v1388_v59  ;;  %v1422_v26 = vcombine.high %v1396_v54, %v1404_v61 }
 0x8dc   :  { %v3521_v2 = vrot.slane %v1405_v40, %v3510_v36  ;;  %v3524_v49 = vrot.slane %v1421_v1, %v3510_v36  ;;  %v1420_v35 = vrot.slane %v1406_v17, %v3510_v36  ;;  %v1436_v38 = vrot.slane %v1422_v26, %v3510_v36 }
 0x8de   :  { %v1437_v3 = vcombine.low %v3521_v2, %v3524_v49  ;;  %v1440_v58 = vcombine.high %v1420_v35, %v1436_v38 }
 0x922   :  { %v1909_v8 = vpop.f32.mrb[32].mxu1 }
 0x923   :  { %v2621_v9 = vpop.f32.mrb[33].mxu1  ;;  %2053 = vxpose.xlu1.b32.start.end [1/1] (short) (narrow) %v1909_v8, 8 }
 0x924   :  { %v1912_v10 = vpop.f32.mrb[34].mxu1 }
 0x925   :  { %v2622_v11 = vpop.f32.mrb[35].mxu1 }
 0x946   :  { %v1955_v12 = vpop.f32.mrb[36].mxu0 }
 0x947   :  { %v2627_v13 = vpop.f32.mrb[37].mxu0  ;;  %2085 = vxpose.xlu0.b32.start.end [1/1] (short) (narrow) %v1955_v12, 8 }
 0x948   :  { %v1958_v14 = vpop.f32.mrb[38].mxu0 }
 0x949   :  { %v2628_v15 = vpop.f32.mrb[39].mxu0 }
 0x973   :  { %v2001_v47 = vpop.f32.mrb[36].mxu1 }
 0x974   :  { %v2633_v48 = vpop.f32.mrb[37].mxu1  ;;  %2117 = vxpose.xlu1.b32.start.end [1/1] (short) (narrow) %v2001_v47, 8 }
 0x975   :  { %v2004_v42 = vpop.f32.mrb[38].mxu1  ;;  %v1439_v48 = vcombine.low %v1420_v35, %v1436_v38 }
 0x976   :  { %v2634_v50 = vpop.f32.mrb[39].mxu1 }
 0x977   :  { %v1438_v50 = vcombine.high %v3521_v2, %v3524_v49 }
 0x97b   :  { %v2047_v57 = vpop.f32.mrb[40].mxu0 }
 0x97c   :  { %2149 = vxpose.xlu0.b32.start.end [1/1] (short) (narrow) %v2047_v57, 8  ;;  %v2639_v62 = vpop.f32.mrb[41].mxu0 }
 0x97d   :  { %v2050_v63 = vpop.f32.mrb[42].mxu0 }
 0x97e   :  { %v2640_v0 = vpop.f32.mrb[43].mxu0 }
 0x9a3   :  { %v2069_v4 = vpop.trf.xlu1 }
 0x9c7   :  { %v2101_v5 = vpop.trf.xlu0 }
 0x9f4   :  { %v2133_v6 = vpop.trf.xlu1 }
 0x9f5   :  { %v2181_v7 = vcombine.low %v2069_v4, %v2133_v6  ;;  %v2182_v8 = vcombine.high %v2069_v4, %v2133_v6 }
 0x9f7   :  { %v2189_v12 = vrot.slane %v2181_v7, %v3504_v60  ;;  %v2196_v13 = vrot.slane %v2182_v8, %v3504_v60 }
 0x9fc   :  { %v2165_v9 = vpop.trf.xlu0 }
 0x9fd   :  { %v2197_v10 = vcombine.low %v2101_v5, %v2165_v9  ;;  %v2198_v11 = vcombine.high %v2101_v5, %v2165_v9 }
 0x9ff   :  { %v2205_v14 = vrot.slane %v2197_v10, %v3504_v60  ;;  %v2212_v15 = vrot.slane %v2198_v11, %v3504_v60 }
 0xa01   :  { %v2213_v18 = vcombine.low %v2189_v12, %v2205_v14  ;;  %v2214_v19 = vcombine.high %v2189_v12, %v2205_v14  ;;  %v2229_v16 = vcombine.low %v2196_v13, %v2212_v15  ;;  %v2230_v20 = vcombine.high %v2196_v13, %v2212_v15 }
 0xa03   :  { %v2221_v21 = vrot.slane %v2213_v18, %v3510_v36  ;;  %v2228_v22 = vrot.slane %v2214_v19, %v3510_v36  ;;  %v2237_v37 = vrot.slane %v2229_v16, %v3510_v36  ;;  %v2244_v24 = vrot.slane %v2230_v20, %v3510_v36 }
 0xa05   :  { %v2249_v27 = vcombine.low %v2221_v21, %v2228_v22  ;;  %v2448_v28 = vcombine.high %v2221_v21, %v2228_v22  ;;  %v2265_v29 = vcombine.low %v2237_v37, %v2244_v24  ;;  %v2449_v30 = vcombine.high %v2237_v37, %v2244_v24 }
 0xa07   :  { %v2256_v31 = vrot.slane %v2249_v27, %v3504_v60  ;;  %v2264_v32 = vrot.slane %v2448_v28, %v3504_v60  ;;  %v2272_v33 = vrot.slane %v2265_v29, %v3504_v60  ;;  %v2280_v34 = vrot.slane %v2449_v30, %v3504_v60 }
 0xa09   :  { %v2282_v39 = vcombine.high %v2256_v31, %v2264_v32  ;;  %v2298_v41 = vcombine.high %v2272_v33, %v2280_v34  ;;  %v2281_v43 = vcombine.low %v2256_v31, %v2264_v32  ;;  %v2297_v44 = vcombine.low %v2272_v33, %v2280_v34 }
 0xa0b   :  { %v2296_v23 = vrot.slane %v2282_v39, %v3510_v36  ;;  %v2312_v55 = vrot.slane %v2298_v41, %v3510_v36  ;;  %v2289_v47 = vrot.slane %v2281_v43, %v3510_v36  ;;  %v2305_v60 = vrot.slane %v2297_v44, %v3510_v36 }
 0xa0d   :  { %v2315_v42 = vcombine.low %v2296_v23, %v2312_v55  ;;  %v2314_v45 = vcombine.high %v2289_v47, %v2305_v60  ;;  %v2313_v51 = vcombine.low %v2289_v47, %v2305_v60  ;;  %v2316_v56 = vcombine.high %v2296_v23, %v2312_v55 }
 0xa0f   :  { %v2679_v52 = vpack.i.bf16 %v2315_v42, %v1439_v48  ;;  %v2674_v53 = vpack.i.bf16 %v2314_v45, %v1438_v50  ;;  %v2684_v59 = vpack.i.bf16 %v2316_v56, %v1440_v58 }
 0xa11   :  { %2680 = vrot.lane.b32.xlu0 %v2679_v52, %s3018_s4  ;;  %2675 = vrot.lane.b32.xlu1 %v2674_v53, %s3000_s26 }
 0xa15   :  { %2685 = vrot.lane.b32.xlu1 %v2684_v59, %s3019_s22 }
 0xa83   :  { %v2681_v36 = vpop.permute.xlu0 %2680  ;;  %v2676_v54 = vpop.permute.xlu1 %2675 }
 0xa84   :  { %v2678_v61 = vunpack.i.h.bf16 %v2676_v54  ;;  %v2677_v57 = vunpack.i.l.bf16 %v2676_v54  ;;  %v2683_v62 = vunpack.i.h.bf16 %v2681_v36  ;;  %v2682_v63 = vunpack.i.l.bf16 %v2681_v36 }
 0xa86   :  { %v1453_v0 = vsel %vm694_vm3, %v1437_v3, %v2677_v57  ;;  %v2329_v40 = vsel %vm694_vm3, %v2313_v51, %v2678_v61 }
 0xa87   :  { %v2686_v1 = vpop.permute.xlu1 %2685  ;;  %v1455_v6 = vsel %vm1454_vm5, %v1453_v0, %v2682_v63  ;;  %v2330_v7 = vsel %vm1454_vm5, %v2329_v40, %v2683_v62 }
 0xa88   :  { %v2688_v4 = vunpack.i.h.bf16 %v2686_v1  ;;  %v2687_v5 = vunpack.i.l.bf16 %v2686_v1 }
 0xa8a   :  { %v1456_v8 = vsel %vm880_vm4, %v1455_v6, %v2687_v5  ;;  %v2331_v9 = vsel %vm880_vm4, %v2330_v7, %v2688_v4 }
 0xa8b   :  { %v2332_v10 = vpack.c.bf16 %v2331_v9, %v1456_v8 }
 0xa8d   :  { %2646 = vmatmul.mubr.msk.bf16.vlgmr.msra.gmra.mrb[40].mxu1 %vm173_vm0, %v2332_v10 }
 0xb60   :  { %v2382_v2 = vpop.f32.mrb[40].mxu1 }
 0xb61   :  { %2389 = vst.msk [vmem:[#allocation19] sm:$0xff] %vm173_vm0, %v2382_v2  ;;  %v2647_v49 = vpop.f32.mrb[41].mxu1 }
 0xb62   :  { %v2385_v3 = vpop.f32.mrb[42].mxu1 }
 0xb63   :  { %2390 = vst.msk [vmem:[#allocation19 + $0x8] sm:$0xff] %vm173_vm0, %v2385_v3  ;;  %v2648_v11 = vpop.f32.mrb[43].mxu1 }
 0xb64   :  { %2972 = shalt.err (!%p2969_p0)
}
 0xb65   :  { %s2973_s14 = scalar_lea.hbm %s3585_s10, 256 }
 0xb66   :  { %p2974_p1 = scmp.ne.s32.totalorder %s3585_s10, %s2973_s14  ;;  %p2977_p2 = scmp.lt.u32.totalorder %s2973_s14, %s3585_s10 }
 0xb68   :  { %p2979_p3 = pnand %p2977_p2, %p2974_p1 }
 0xb6a   :  { %2982 = shalt.err (!%p2979_p3)
}
 0xb6b   :  { %2402 = dma.vmem_to_hbm [thread:$0]  %s2397_s17, 256, %s3585_s10, [#allocation4], %s2999_s25, %s2999_s25, %s3000_s26  }
 0xb6c   :  { %2995 = dma.done.wait [#allocation4], 256  }
 0xb6d   :  { %2996 = vsyncadd [#allocation4], 4294967040 }
 0xb6e   :  { %2406 = vsyncpa [#allocation3], 1 }
 0xb6f   :  { %2407 = vsyncpa [#allocation6], 1 }
 0xb70   :  { %2408 = vsyncpa [#allocation9], 1 }
 0xb71   :  { %2409 = vsyncpa [#allocation12], 1 }
 0xb72   :  { %2410 = vsyncpa [#allocation15], 1 }
 0xb73   :  { %2411 = vsyncpa [#allocation18], 1 }
 0xb74   :  { %2412 = vsyncpa [#allocation4], 1 }

</bundles_post_ra>
